<compile_context>
chip_gen: v7x
topology: tpu7x:2x2x1
jax: 0.10.0
libtpu: 0.0.40
codegen_flags: <defaults>
</compile_context>

<pallas_src>
import jax
import jax.numpy as jnp
from jax.experimental import pallas as pl
from jax.experimental.pallas import tpu as pltpu

K = 5     # conv kernel size
PAD = 2   # conv padding
C1 = 16   # conv1 out channels
C2 = 32   # conv2 out channels
H = 64    # fc1 hidden size

# f32 keeps the 1e-4 check against the f32 reference exact enough; set to
# jnp.bfloat16 on v6e/v7x for ~3x MXU throughput if accuracy budget allows.
MXU_DTYPE = jnp.float32


def _round_up(a, m):
    return (a + m - 1) // m * m


def _make_kernel(L, Lp8, reshape_flatten=True):
    def kernel(xpp_ref, w1_ref, b1_ref, w2_ref, b2_ref,
               wf1_ref, bf1_ref, wf2_ref, bf2_ref, o_ref):
        # xpp_ref: (BT, Lpp)  x padded by 2*PAD front / Lp8-L+2*PAD total back
        # w1_ref : (K, C1) im2col        b1_ref : (1, C1)
        # w2_ref : (K*C1, C2) im2col     b2_ref : (1, C2)
        # wf1_ref: (L*C2, H) (l,c)-major bf1_ref: (1, H)
        # wf2_ref: (1, H)                bf2_ref: (1, 1)
        # o_ref  : (1, BT)
        BT = xpp_ref.shape[0]
        x = xpp_ref[...]                                    # (BT, Lpp)

        # ---- conv1 + ReLU as ONE im2col MXU matmul over the conv2 halo ----
        # xwin[b, j, k] = x[b, j + k],  j in [0, Lp8)
        xwin = jnp.concatenate([x[:, k:k + Lp8, None] for k in range(K)],
                               axis=2)                      # (BT, Lp8, K)
        h1 = jnp.dot(xwin.reshape(BT * Lp8, K).astype(w1_ref.dtype),
                     w1_ref[...], preferred_element_type=jnp.float32)
        h1 = jnp.maximum(h1 + b1_ref[...], 0.0).reshape(BT, Lp8, C1)

        # zero the halo -> value-level zero padding of relu(conv1(x))
        pos = jax.lax.broadcasted_iota(jnp.int32, (BT, Lp8, C1), 1)
        h1p = jnp.where((pos >= PAD) & (pos < PAD + L), h1, 0.0)

        # ---- conv2 + ReLU as ONE im2col MXU matmul ----
        # win[b, l, k*C1 + c] = h1p[b, l + k, c]
        win = jnp.concatenate([h1p[:, k:k + L, :] for k in range(K)], axis=2)
        h2 = jnp.dot(win.reshape(BT * L, K * C1).astype(w2_ref.dtype),
                     w2_ref[...], preferred_element_type=jnp.float32)
        h2 = jnp.maximum(h2 + b2_ref[...], 0.0)             # (BT*L, C2)

        # ---- flatten to (BT, L*C2): rows are (b, l)-major, so the row-major
        #      reshape is bit-identical to the (l, c)-major flatten ----
        if reshape_flatten:
            h2f = h2.reshape(BT, L * C2)
        else:  # known-good (slower) lane-concat fallback
            h2v = h2.reshape(BT, L, C2)
            h2f = jnp.concatenate([h2v[:, l, :] for l in range(L)], axis=1)

        # ---- fc1 + ReLU: ONE MXU matmul ----
        f1 = jnp.dot(h2f.astype(wf1_ref.dtype), wf1_ref[...],
                     preferred_element_type=jnp.float32)
        f1 = jnp.maximum(f1 + bf1_ref[...], 0.0)            # (BT, H)

        # ---- fc2 on the VPU, stored lane-dense as one (1, BT) row ----
        o_ref[...] = jnp.sum(f1 * wf2_ref[...], axis=1)[None, :] + bf2_ref[...]

    return kernel


def _choose_bt(B, L):
    """Batch-tile rows: MXU-friendly, VMEM-aware, >=2 grid steps when possible."""
    bt = min(128, _round_up(B, 8))
    # Keep the dominant per-step f32 intermediate (the K*C1-wide im2col window,
    # ~BT*L*K*C1*4 B) under ~8 MiB so v7x's 64 MiB VMEM stays comfortable.
    rows_budget = max(8, ((8 << 20) // max(1, L * K * C1 * 4)) // 8 * 8)
    bt = min(bt, rows_budget)
    # Guarantee >=2 grid steps when the batch is big enough to split, so both
    # v7x TensorCores get work and input/output DMAs overlap compute.
    while B > 8 and bt > 8 and B <= bt:
        bt = max(8, _round_up(bt // 2, 8))
    return bt


def cnn1d_forward(x, params):
    """x: (B, L) float32 — equivalent of CNN1D(input_size=L).forward(x)."""
    W1, b1, W2, b2, Wfc1, bfc1, Wfc2, bfc2 = params
    B, L = x.shape

    BT = _choose_bt(B, L)
    Bp = _round_up(B, BT)
    G = Bp // BT

    Lp = L + 2 * PAD                 # conv2 halo range
    Lp8 = _round_up(Lp, 8)           # sublane-aligned halo range
    Lpp = Lp8 + 2 * PAD              # padded length handed to the kernel

    # glue: batch + spatial zero-padding, parameter re-layout (pure reshapes)
    xpp = jnp.pad(x, ((0, Bp - B), (2 * PAD, Lpp - L - 2 * PAD)))  # (Bp, Lpp)
    w1k = jnp.transpose(W1[:, 0, :]).astype(MXU_DTYPE)             # (K, C1)
    w2f = (jnp.transpose(W2, (2, 1, 0)).reshape(K * C1, C2)
           .astype(MXU_DTYPE))                                     # (K*C1, C2)
    # PyTorch flattens (B, C2, L) channel-major (idx = c*L + l); the kernel
    # flattens (l, c)-major: wf1[l*C2 + c, o] = Wfc1[o, c*L + l].
    wf1 = (jnp.transpose(Wfc1.reshape(H, C2, L), (2, 1, 0))
           .reshape(L * C2, H).astype(MXU_DTYPE))
    args = (xpp, w1k, b1.reshape(1, C1), w2f, b2.reshape(1, C2),
            wf1, bfc1.reshape(1, H), Wfc2.reshape(1, H), bfc2.reshape(1, 1))

    def build(fast):
        wkw = dict(pipeline_mode=pl.Buffered(1)) if fast else {}

        def wspec(shape):          # resident (constant-index) weight block
            return pl.BlockSpec(shape, lambda i: (0, 0), **wkw)

        return pl.pallas_call(
            _make_kernel(L, Lp8, reshape_flatten=fast),
            out_shape=jax.ShapeDtypeStruct((G, BT), jnp.float32),
            grid_spec=pltpu.PrefetchScalarGridSpec(
                num_scalar_prefetch=0,
                grid=(G,),
                in_specs=[
                    pl.BlockSpec((BT, Lpp), lambda i: (i, 0)),     # x tile
                    wspec((K, C1)), wspec((1, C1)),
                    wspec((K * C1, C2)), wspec((1, C2)),
                    wspec((L * C2, H)), wspec((1, H)),
                    wspec((1, H)), wspec((1, 1)),
                ],
                out_specs=pl.BlockSpec((1, BT), lambda i: (i, 0)),
            ),
            compiler_params=pltpu.CompilerParams(
                dimension_semantics=("parallel",),
                vmem_limit_bytes=48 * 1024 * 1024,
            ),
        )

    try:
        out = build(fast=True)(*args)
    except Exception:
        # Conservative fallback (double-buffered weights, lane-concat flatten)
        # in case this toolchain rejects Buffered(1) or the merge reshape.
        out = build(fast=False)(*args)

    return out.reshape(Bp)[:B].reshape(B, 1)


def cnn1d_reference(x, params):
    """Pure-JAX reference mirroring the PyTorch forward exactly."""
    W1, b1, W2, b2, Wfc1, bfc1, Wfc2, bfc2 = params
    B, L = x.shape
    h = x[:, None, :]                                         # (B, 1, L)  NCL
    h = jax.lax.conv_general_dilated(h, W1, (1,), [(PAD, PAD)],
                                     dimension_numbers=('NCH', 'OIH', 'NCH'))
    h = jax.nn.relu(h + b1[None, :, None])
    h = jax.lax.conv_general_dilated(h, W2, (1,), [(PAD, PAD)],
                                     dimension_numbers=('NCH', 'OIH', 'NCH'))
    h = jax.nn.relu(h + b2[None, :, None])
    h = h.reshape(B, -1)                                      # channel-major
    h = jax.nn.relu(h @ Wfc1.T + bfc1)
    return h @ Wfc2.T + bfc2


def init_params(key, input_size):
    ks = jax.random.split(key, 8)
    W1 = jax.random.normal(ks[0], (C1, 1, K), jnp.float32) * 0.2
    b1 = jax.random.normal(ks[1], (C1,), jnp.float32) * 0.1
    W2 = jax.random.normal(ks[2], (C2, C1, K), jnp.float32) * 0.1
    b2 = jax.random.normal(ks[3], (C2,), jnp.float32) * 0.1
    Wfc1 = jax.random.normal(ks[4], (H, C2 * input_size), jnp.float32) * 0.05
    bfc1 = jax.random.normal(ks[5], (H,), jnp.float32) * 0.1
    Wfc2 = jax.random.normal(ks[6], (1, H), jnp.float32) * 0.1
    bfc2 = jax.random.normal(ks[7], (1,), jnp.float32) * 0.1
    return (W1, b1, W2, b2, Wfc1, bfc1, Wfc2, bfc2)


if __name__ == "__main__":
    key = jax.random.PRNGKey(0)
    k_x, k_p = jax.random.split(key)
    batch, input_size = 2, 16
    x = jax.random.normal(k_x, (batch, input_size), jnp.float32)
    params = init_params(k_p, input_size)

    out = jax.block_until_ready(cnn1d_forward(x, params))
    ref = jax.block_until_ready(cnn1d_reference(x, params))

    assert out.shape == (batch, 1), out.shape
    assert jnp.allclose(out, ref, atol=1e-4, rtol=1e-4), (out, ref)
    print("KERNEL_OK")
</pallas_src>

<mosaic_0001>
module attributes {stable_mosaic.version = 11 : i64} {
  func.func @kernel(%arg0: i32, %arg1: memref<8x28xf32, #tpu.memory_space<vmem>>, %arg2: memref<5x16xf32, #tpu.memory_space<vmem>>, %arg3: memref<1x16xf32, #tpu.memory_space<vmem>>, %arg4: memref<80x32xf32, #tpu.memory_space<vmem>>, %arg5: memref<1x32xf32, #tpu.memory_space<vmem>>, %arg6: memref<512x64xf32, #tpu.memory_space<vmem>>, %arg7: memref<1x64xf32, #tpu.memory_space<vmem>>, %arg8: memref<1x64xf32, #tpu.memory_space<vmem>>, %arg9: memref<1x1xf32, #tpu.memory_space<vmem>>, %arg10: memref<1x8xf32, #tpu.memory_space<vmem>>) attributes {dimension_semantics = [#tpu.dimension_semantics<parallel>], iteration_bounds = array<i64: 1>, scalar_prefetch = 0 : i64, scratch_operands = 0 : i64, tpu.core_type = #tpu.core_type<tc>, window_params = [{transform_indices = @transform_0, window_bounds = array<i64: 8, 28>}, {pipeline_mode = #tpu.pipeline_mode<synchronous>, transform_indices = @transform_1, window_bounds = array<i64: 5, 16>}, {pipeline_mode = #tpu.pipeline_mode<synchronous>, transform_indices = @transform_2, window_bounds = array<i64: 1, 16>}, {pipeline_mode = #tpu.pipeline_mode<synchronous>, transform_indices = @transform_3, window_bounds = array<i64: 80, 32>}, {pipeline_mode = #tpu.pipeline_mode<synchronous>, transform_indices = @transform_4, window_bounds = array<i64: 1, 32>}, {pipeline_mode = #tpu.pipeline_mode<synchronous>, transform_indices = @transform_5, window_bounds = array<i64: 512, 64>}, {pipeline_mode = #tpu.pipeline_mode<synchronous>, transform_indices = @transform_6, window_bounds = array<i64: 1, 64>}, {pipeline_mode = #tpu.pipeline_mode<synchronous>, transform_indices = @transform_7, window_bounds = array<i64: 1, 64>}, {pipeline_mode = #tpu.pipeline_mode<synchronous>, transform_indices = @transform_8, window_bounds = array<i64: 1, 1>}, {transform_indices = @transform_9, window_bounds = array<i64: 1, 8>}]} {
    %c0 = arith.constant 0 : index
    %c0_0 = arith.constant 0 : index
    %0 = vector.load %arg1[%c0, %c0_0] : memref<8x28xf32, #tpu.memory_space<vmem>>, vector<8x28xf32>
    %1 = vector.extract_strided_slice %0 {offsets = [0, 0], sizes = [8, 24], strides = [1, 1]} : vector<8x28xf32> to vector<8x24xf32>
    %2 = vector.shape_cast %1 : vector<8x24xf32> to vector<8x24x1xf32>
    %3 = vector.extract_strided_slice %0 {offsets = [0, 1], sizes = [8, 24], strides = [1, 1]} : vector<8x28xf32> to vector<8x24xf32>
    %4 = vector.shape_cast %3 : vector<8x24xf32> to vector<8x24x1xf32>
    %5 = vector.extract_strided_slice %0 {offsets = [0, 2], sizes = [8, 24], strides = [1, 1]} : vector<8x28xf32> to vector<8x24xf32>
    %6 = vector.shape_cast %5 : vector<8x24xf32> to vector<8x24x1xf32>
    %7 = vector.extract_strided_slice %0 {offsets = [0, 3], sizes = [8, 24], strides = [1, 1]} : vector<8x28xf32> to vector<8x24xf32>
    %8 = vector.shape_cast %7 : vector<8x24xf32> to vector<8x24x1xf32>
    %9 = vector.extract_strided_slice %0 {offsets = [0, 4], sizes = [8, 24], strides = [1, 1]} : vector<8x28xf32> to vector<8x24xf32>
    %10 = vector.shape_cast %9 : vector<8x24xf32> to vector<8x24x1xf32>
    %11 = tpu.concatenate %2, %4, %6, %8, %10 in 2 : vector<8x24x1xf32>, vector<8x24x1xf32>, vector<8x24x1xf32>, vector<8x24x1xf32>, vector<8x24x1xf32> -> vector<8x24x5xf32>
    %12 = vector.shape_cast %11 : vector<8x24x5xf32> to vector<192x5xf32>
    %c0_1 = arith.constant 0 : index
    %c0_2 = arith.constant 0 : index
    %13 = vector.load %arg2[%c0_1, %c0_2] : memref<5x16xf32, #tpu.memory_space<vmem>>, vector<5x16xf32>
    %cst = arith.constant dense<0.000000e+00> : vector<192x16xf32>
    %14 = tpu.matmul %12, %13, %cst {dimension_numbers = #tpu.dot_dimension_numbers<[1], [0], [0], [1], [0, 0, 1, 1], [], []>} : vector<192x5xf32>, vector<5x16xf32>, vector<192x16xf32> -> vector<192x16xf32>
    %c0_3 = arith.constant 0 : index
    %c0_4 = arith.constant 0 : index
    %15 = vector.load %arg3[%c0_3, %c0_4] : memref<1x16xf32, #tpu.memory_space<vmem>>, vector<1x16xf32>
    %16 = vector.broadcast %15 : vector<1x16xf32> to vector<192x16xf32>
    %17 = arith.addf %14, %16 : vector<192x16xf32>
    %cst_5 = arith.constant 0.000000e+00 : f32
    %18 = vector.broadcast %cst_5 : f32 to vector<192x16xf32>
    %19 = arith.maximumf %17, %18 : vector<192x16xf32>
    %20 = vector.shape_cast %19 : vector<192x16xf32> to vector<8x24x16xf32>
    %21 = tpu.iota {dimensions = array<i32: 1>} : vector<8x24x16xi32>
    %c2_i32 = arith.constant 2 : i32
    %22 = vector.broadcast %c2_i32 : i32 to vector<8x24x16xi32>
    %23 = arith.cmpi sge, %21, %22 : vector<8x24x16xi32>
    %c18_i32 = arith.constant 18 : i32
    %24 = vector.broadcast %c18_i32 : i32 to vector<8x24x16xi32>
    %25 = arith.cmpi slt, %21, %24 : vector<8x24x16xi32>
    %26 = arith.andi %23, %25 : vector<8x24x16xi1>
    %cst_6 = arith.constant 0.000000e+00 : f32
    %27 = vector.broadcast %cst_6 : f32 to vector<8x24x16xf32>
    %28 = arith.select %26, %20, %27 : vector<8x24x16xi1>, vector<8x24x16xf32>
    %29 = vector.extract_strided_slice %28 {offsets = [0, 0, 0], sizes = [8, 16, 16], strides = [1, 1, 1]} : vector<8x24x16xf32> to vector<8x16x16xf32>
    %30 = vector.extract_strided_slice %28 {offsets = [0, 1, 0], sizes = [8, 16, 16], strides = [1, 1, 1]} : vector<8x24x16xf32> to vector<8x16x16xf32>
    %31 = vector.extract_strided_slice %28 {offsets = [0, 2, 0], sizes = [8, 16, 16], strides = [1, 1, 1]} : vector<8x24x16xf32> to vector<8x16x16xf32>
    %32 = vector.extract_strided_slice %28 {offsets = [0, 3, 0], sizes = [8, 16, 16], strides = [1, 1, 1]} : vector<8x24x16xf32> to vector<8x16x16xf32>
    %33 = vector.extract_strided_slice %28 {offsets = [0, 4, 0], sizes = [8, 16, 16], strides = [1, 1, 1]} : vector<8x24x16xf32> to vector<8x16x16xf32>
    %34 = tpu.concatenate %29, %30, %31, %32, %33 in 2 : vector<8x16x16xf32>, vector<8x16x16xf32>, vector<8x16x16xf32>, vector<8x16x16xf32>, vector<8x16x16xf32> -> vector<8x16x80xf32>
    %35 = vector.shape_cast %34 : vector<8x16x80xf32> to vector<128x80xf32>
    %c0_7 = arith.constant 0 : index
    %c0_8 = arith.constant 0 : index
    %36 = vector.load %arg4[%c0_7, %c0_8] : memref<80x32xf32, #tpu.memory_space<vmem>>, vector<80x32xf32>
    %cst_9 = arith.constant dense<0.000000e+00> : vector<128x32xf32>
    %37 = tpu.matmul %35, %36, %cst_9 {dimension_numbers = #tpu.dot_dimension_numbers<[1], [0], [0], [1], [0, 0, 1, 1], [], []>} : vector<128x80xf32>, vector<80x32xf32>, vector<128x32xf32> -> vector<128x32xf32>
    %c0_10 = arith.constant 0 : index
    %c0_11 = arith.constant 0 : index
    %38 = vector.load %arg5[%c0_10, %c0_11] : memref<1x32xf32, #tpu.memory_space<vmem>>, vector<1x32xf32>
    %39 = vector.broadcast %38 : vector<1x32xf32> to vector<128x32xf32>
    %40 = arith.addf %37, %39 : vector<128x32xf32>
    %cst_12 = arith.constant 0.000000e+00 : f32
    %41 = vector.broadcast %cst_12 : f32 to vector<128x32xf32>
    %42 = arith.maximumf %40, %41 : vector<128x32xf32>
    %43 = vector.shape_cast %42 : vector<128x32xf32> to vector<8x512xf32>
    %c0_13 = arith.constant 0 : index
    %c0_14 = arith.constant 0 : index
    %44 = vector.load %arg6[%c0_13, %c0_14] : memref<512x64xf32, #tpu.memory_space<vmem>>, vector<512x64xf32>
    %cst_15 = arith.constant dense<0.000000e+00> : vector<8x64xf32>
    %45 = tpu.matmul %43, %44, %cst_15 {dimension_numbers = #tpu.dot_dimension_numbers<[1], [0], [0], [1], [0, 0, 1, 1], [], []>} : vector<8x512xf32>, vector<512x64xf32>, vector<8x64xf32> -> vector<8x64xf32>
    %c0_16 = arith.constant 0 : index
    %c0_17 = arith.constant 0 : index
    %46 = vector.load %arg7[%c0_16, %c0_17] : memref<1x64xf32, #tpu.memory_space<vmem>>, vector<1x64xf32>
    %47 = vector.broadcast %46 : vector<1x64xf32> to vector<8x64xf32>
    %48 = arith.addf %45, %47 : vector<8x64xf32>
    %cst_18 = arith.constant 0.000000e+00 : f32
    %49 = vector.broadcast %cst_18 : f32 to vector<8x64xf32>
    %50 = arith.maximumf %48, %49 : vector<8x64xf32>
    %c0_19 = arith.constant 0 : index
    %c0_20 = arith.constant 0 : index
    %51 = vector.load %arg8[%c0_19, %c0_20] : memref<1x64xf32, #tpu.memory_space<vmem>>, vector<1x64xf32>
    %52 = vector.broadcast %51 : vector<1x64xf32> to vector<8x64xf32>
    %53 = arith.mulf %50, %52 : vector<8x64xf32>
    %cst_21 = arith.constant dense<0.000000e+00> : vector<8xf32>
    %54 = vector.multi_reduction <add>, %53, %cst_21 [1] : vector<8x64xf32> to vector<8xf32>
    %55 = vector.shape_cast %54 : vector<8xf32> to vector<1x8xf32>
    %c0_22 = arith.constant 0 : index
    %c0_23 = arith.constant 0 : index
    %56 = vector.load %arg9[%c0_22, %c0_23] : memref<1x1xf32, #tpu.memory_space<vmem>>, vector<1x1xf32>
    %57 = vector.broadcast %56 : vector<1x1xf32> to vector<1x8xf32>
    %58 = arith.addf %55, %57 : vector<1x8xf32>
    %c0_24 = arith.constant 0 : index
    %c0_25 = arith.constant 0 : index
    %59 = vector.load %arg10[%c0_24, %c0_25] : memref<1x8xf32, #tpu.memory_space<vmem>>, vector<1x8xf32>
    tpu.vector_store %arg10[%c0_24, %c0_25], %58 {strides = array<i32>} : memref<1x8xf32, #tpu.memory_space<vmem>>, vector<1x8xf32>,
    return
  }
  func.func @transform_0(%arg0: i32) -> (i32, i32) {
    %c0_i32 = arith.constant 0 : i32
    %c0_i32_0 = arith.constant 0 : i32
    return %arg0, %c0_i32 : i32, i32
  }
  func.func @transform_1(%arg0: i32) -> (i32, i32) {
    %c0_i32 = arith.constant 0 : i32
    %c0_i32_0 = arith.constant 0 : i32
    %c0_i32_1 = arith.constant 0 : i32
    return %c0_i32, %c0_i32_0 : i32, i32
  }
  func.func @transform_2(%arg0: i32) -> (i32, i32) {
    %c0_i32 = arith.constant 0 : i32
    %c0_i32_0 = arith.constant 0 : i32
    %c0_i32_1 = arith.constant 0 : i32
    return %c0_i32, %c0_i32_0 : i32, i32
  }
  func.func @transform_3(%arg0: i32) -> (i32, i32) {
    %c0_i32 = arith.constant 0 : i32
    %c0_i32_0 = arith.constant 0 : i32
    %c0_i32_1 = arith.constant 0 : i32
    return %c0_i32, %c0_i32_0 : i32, i32
  }
  func.func @transform_4(%arg0: i32) -> (i32, i32) {
    %c0_i32 = arith.constant 0 : i32
    %c0_i32_0 = arith.constant 0 : i32
    %c0_i32_1 = arith.constant 0 : i32
    return %c0_i32, %c0_i32_0 : i32, i32
  }
  func.func @transform_5(%arg0: i32) -> (i32, i32) {
    %c0_i32 = arith.constant 0 : i32
    %c0_i32_0 = arith.constant 0 : i32
    %c0_i32_1 = arith.constant 0 : i32
    return %c0_i32, %c0_i32_0 : i32, i32
  }
  func.func @transform_6(%arg0: i32) -> (i32, i32) {
    %c0_i32 = arith.constant 0 : i32
    %c0_i32_0 = arith.constant 0 : i32
    %c0_i32_1 = arith.constant 0 : i32
    return %c0_i32, %c0_i32_0 : i32, i32
  }
  func.func @transform_7(%arg0: i32) -> (i32, i32) {
    %c0_i32 = arith.constant 0 : i32
    %c0_i32_0 = arith.constant 0 : i32
    %c0_i32_1 = arith.constant 0 : i32
    return %c0_i32, %c0_i32_0 : i32, i32
  }
  func.func @transform_8(%arg0: i32) -> (i32, i32) {
    %c0_i32 = arith.constant 0 : i32
    %c0_i32_0 = arith.constant 0 : i32
    %c0_i32_1 = arith.constant 0 : i32
    return %c0_i32, %c0_i32_0 : i32, i32
  }
  func.func @transform_9(%arg0: i32) -> (i32, i32) {
    %c0_i32 = arith.constant 0 : i32
    %c0_i32_0 = arith.constant 0 : i32
    return %arg0, %c0_i32 : i32, i32
  }
}

module attributes {stable_mosaic.version = 11 : i64} {
  func.func @kernel(%arg0: i32, %arg1: memref<8x28xf32, #tpu.memory_space<vmem>>, %arg2: memref<5x16xf32, #tpu.memory_space<vmem>>, %arg3: memref<1x16xf32, #tpu.memory_space<vmem>>, %arg4: memref<80x32xf32, #tpu.memory_space<vmem>>, %arg5: memref<1x32xf32, #tpu.memory_space<vmem>>, %arg6: memref<512x64xf32, #tpu.memory_space<vmem>>, %arg7: memref<1x64xf32, #tpu.memory_space<vmem>>, %arg8: memref<1x64xf32, #tpu.memory_space<vmem>>, %arg9: memref<1x1xf32, #tpu.memory_space<vmem>>, %arg10: memref<1x8xf32, #tpu.memory_space<vmem>>) attributes {dimension_semantics = [#tpu.dimension_semantics<parallel>], iteration_bounds = array<i64: 1>, scalar_prefetch = 0 : i64, scratch_operands = 0 : i64, tpu.core_type = #tpu.core_type<tc>, window_params = [{transform_indices = @transform_0, window_bounds = array<i64: 8, 28>}, {pipeline_mode = #tpu.pipeline_mode<synchronous>, transform_indices = @transform_1, window_bounds = array<i64: 5, 16>}, {pipeline_mode = #tpu.pipeline_mode<synchronous>, transform_indices = @transform_2, window_bounds = array<i64: 1, 16>}, {pipeline_mode = #tpu.pipeline_mode<synchronous>, transform_indices = @transform_3, window_bounds = array<i64: 80, 32>}, {pipeline_mode = #tpu.pipeline_mode<synchronous>, transform_indices = @transform_4, window_bounds = array<i64: 1, 32>}, {pipeline_mode = #tpu.pipeline_mode<synchronous>, transform_indices = @transform_5, window_bounds = array<i64: 512, 64>}, {pipeline_mode = #tpu.pipeline_mode<synchronous>, transform_indices = @transform_6, window_bounds = array<i64: 1, 64>}, {pipeline_mode = #tpu.pipeline_mode<synchronous>, transform_indices = @transform_7, window_bounds = array<i64: 1, 64>}, {pipeline_mode = #tpu.pipeline_mode<synchronous>, transform_indices = @transform_8, window_bounds = array<i64: 1, 1>}, {transform_indices = @transform_9, window_bounds = array<i64: 1, 8>}]} {
    %c0 = arith.constant 0 : index
    %c0_0 = arith.constant 0 : index
    %0 = vector.load %arg1[%c0, %c0_0] : memref<8x28xf32, #tpu.memory_space<vmem>>, vector<8x28xf32>
    %1 = vector.extract_strided_slice %0 {offsets = [0, 0], sizes = [8, 24], strides = [1, 1]} : vector<8x28xf32> to vector<8x24xf32>
    %2 = vector.shape_cast %1 : vector<8x24xf32> to vector<8x24x1xf32>
    %3 = vector.extract_strided_slice %0 {offsets = [0, 1], sizes = [8, 24], strides = [1, 1]} : vector<8x28xf32> to vector<8x24xf32>
    %4 = vector.shape_cast %3 : vector<8x24xf32> to vector<8x24x1xf32>
    %5 = vector.extract_strided_slice %0 {offsets = [0, 2], sizes = [8, 24], strides = [1, 1]} : vector<8x28xf32> to vector<8x24xf32>
    %6 = vector.shape_cast %5 : vector<8x24xf32> to vector<8x24x1xf32>
    %7 = vector.extract_strided_slice %0 {offsets = [0, 3], sizes = [8, 24], strides = [1, 1]} : vector<8x28xf32> to vector<8x24xf32>
    %8 = vector.shape_cast %7 : vector<8x24xf32> to vector<8x24x1xf32>
    %9 = vector.extract_strided_slice %0 {offsets = [0, 4], sizes = [8, 24], strides = [1, 1]} : vector<8x28xf32> to vector<8x24xf32>
    %10 = vector.shape_cast %9 : vector<8x24xf32> to vector<8x24x1xf32>
    %11 = tpu.concatenate %2, %4, %6, %8, %10 in 2 : vector<8x24x1xf32>, vector<8x24x1xf32>, vector<8x24x1xf32>, vector<8x24x1xf32>, vector<8x24x1xf32> -> vector<8x24x5xf32>
    %12 = vector.shape_cast %11 : vector<8x24x5xf32> to vector<192x5xf32>
    %c0_1 = arith.constant 0 : index
    %c0_2 = arith.constant 0 : index
    %13 = vector.load %arg2[%c0_1, %c0_2] : memref<5x16xf32, #tpu.memory_space<vmem>>, vector<5x16xf32>
    %cst = arith.constant dense<0.000000e+00> : vector<192x16xf32>
    %14 = tpu.matmul %12, %13, %cst {dimension_numbers = #tpu.dot_dimension_numbers<[1], [0], [0], [1], [0, 0, 1, 1], [], []>} : vector<192x5xf32>, vector<5x16xf32>, vector<192x16xf32> -> vector<192x16xf32>
    %c0_3 = arith.constant 0 : index
    %c0_4 = arith.constant 0 : index
    %15 = vector.load %arg3[%c0_3, %c0_4] : memref<1x16xf32, #tpu.memory_space<vmem>>, vector<1x16xf32>
    %16 = vector.broadcast %15 : vector<1x16xf32> to vector<192x16xf32>
    %17 = arith.addf %14, %16 : vector<192x16xf32>
    %cst_5 = arith.constant 0.000000e+00 : f32
    %18 = vector.broadcast %cst_5 : f32 to vector<192x16xf32>
    %19 = arith.maximumf %17, %18 : vector<192x16xf32>
    %20 = vector.shape_cast %19 : vector<192x16xf32> to vector<8x24x16xf32>
    %21 = tpu.iota {dimensions = array<i32: 1>} : vector<8x24x16xi32>
    %c2_i32 = arith.constant 2 : i32
    %22 = vector.broadcast %c2_i32 : i32 to vector<8x24x16xi32>
    %23 = arith.cmpi sge, %21, %22 : vector<8x24x16xi32>
    %c18_i32 = arith.constant 18 : i32
    %24 = vector.broadcast %c18_i32 : i32 to vector<8x24x16xi32>
    %25 = arith.cmpi slt, %21, %24 : vector<8x24x16xi32>
    %26 = arith.andi %23, %25 : vector<8x24x16xi1>
    %cst_6 = arith.constant 0.000000e+00 : f32
    %27 = vector.broadcast %cst_6 : f32 to vector<8x24x16xf32>
    %28 = arith.select %26, %20, %27 : vector<8x24x16xi1>, vector<8x24x16xf32>
    %29 = vector.extract_strided_slice %28 {offsets = [0, 0, 0], sizes = [8, 16, 16], strides = [1, 1, 1]} : vector<8x24x16xf32> to vector<8x16x16xf32>
    %30 = vector.extract_strided_slice %28 {offsets = [0, 1, 0], sizes = [8, 16, 16], strides = [1, 1, 1]} : vector<8x24x16xf32> to vector<8x16x16xf32>
    %31 = vector.extract_strided_slice %28 {offsets = [0, 2, 0], sizes = [8, 16, 16], strides = [1, 1, 1]} : vector<8x24x16xf32> to vector<8x16x16xf32>
    %32 = vector.extract_strided_slice %28 {offsets = [0, 3, 0], sizes = [8, 16, 16], strides = [1, 1, 1]} : vector<8x24x16xf32> to vector<8x16x16xf32>
    %33 = vector.extract_strided_slice %28 {offsets = [0, 4, 0], sizes = [8, 16, 16], strides = [1, 1, 1]} : vector<8x24x16xf32> to vector<8x16x16xf32>
    %34 = tpu.concatenate %29, %30, %31, %32, %33 in 2 : vector<8x16x16xf32>, vector<8x16x16xf32>, vector<8x16x16xf32>, vector<8x16x16xf32>, vector<8x16x16xf32> -> vector<8x16x80xf32>
    %35 = vector.shape_cast %34 : vector<8x16x80xf32> to vector<128x80xf32>
    %c0_7 = arith.constant 0 : index
    %c0_8 = arith.constant 0 : index
    %36 = vector.load %arg4[%c0_7, %c0_8] : memref<80x32xf32, #tpu.memory_space<vmem>>, vector<80x32xf32>
    %cst_9 = arith.constant dense<0.000000e+00> : vector<128x32xf32>
    %37 = tpu.matmul %35, %36, %cst_9 {dimension_numbers = #tpu.dot_dimension_numbers<[1], [0], [0], [1], [0, 0, 1, 1], [], []>} : vector<128x80xf32>, vector<80x32xf32>, vector<128x32xf32> -> vector<128x32xf32>
    %c0_10 = arith.constant 0 : index
    %c0_11 = arith.constant 0 : index
    %38 = vector.load %arg5[%c0_10, %c0_11] : memref<1x32xf32, #tpu.memory_space<vmem>>, vector<1x32xf32>
    %39 = vector.broadcast %38 : vector<1x32xf32> to vector<128x32xf32>
    %40 = arith.addf %37, %39 : vector<128x32xf32>
    %cst_12 = arith.constant 0.000000e+00 : f32
    %41 = vector.broadcast %cst_12 : f32 to vector<128x32xf32>
    %42 = arith.maximumf %40, %41 : vector<128x32xf32>
    %43 = vector.shape_cast %42 : vector<128x32xf32> to vector<8x16x32xf32>
    %44 = vector.extract_strided_slice %43 {offsets = [0, 0, 0], sizes = [8, 1, 32], strides = [1, 1, 1]} : vector<8x16x32xf32> to vector<8x1x32xf32>
    %45 = vector.shape_cast %44 : vector<8x1x32xf32> to vector<8x32xf32>
    %46 = vector.extract_strided_slice %43 {offsets = [0, 1, 0], sizes = [8, 1, 32], strides = [1, 1, 1]} : vector<8x16x32xf32> to vector<8x1x32xf32>
    %47 = vector.shape_cast %46 : vector<8x1x32xf32> to vector<8x32xf32>
    %48 = vector.extract_strided_slice %43 {offsets = [0, 2, 0], sizes = [8, 1, 32], strides = [1, 1, 1]} : vector<8x16x32xf32> to vector<8x1x32xf32>
    %49 = vector.shape_cast %48 : vector<8x1x32xf32> to vector<8x32xf32>
    %50 = vector.extract_strided_slice %43 {offsets = [0, 3, 0], sizes = [8, 1, 32], strides = [1, 1, 1]} : vector<8x16x32xf32> to vector<8x1x32xf32>
    %51 = vector.shape_cast %50 : vector<8x1x32xf32> to vector<8x32xf32>
    %52 = vector.extract_strided_slice %43 {offsets = [0, 4, 0], sizes = [8, 1, 32], strides = [1, 1, 1]} : vector<8x16x32xf32> to vector<8x1x32xf32>
    %53 = vector.shape_cast %52 : vector<8x1x32xf32> to vector<8x32xf32>
    %54 = vector.extract_strided_slice %43 {offsets = [0, 5, 0], sizes = [8, 1, 32], strides = [1, 1, 1]} : vector<8x16x32xf32> to vector<8x1x32xf32>
    %55 = vector.shape_cast %54 : vector<8x1x32xf32> to vector<8x32xf32>
    %56 = vector.extract_strided_slice %43 {offsets = [0, 6, 0], sizes = [8, 1, 32], strides = [1, 1, 1]} : vector<8x16x32xf32> to vector<8x1x32xf32>
    %57 = vector.shape_cast %56 : vector<8x1x32xf32> to vector<8x32xf32>
    %58 = vector.extract_strided_slice %43 {offsets = [0, 7, 0], sizes = [8, 1, 32], strides = [1, 1, 1]} : vector<8x16x32xf32> to vector<8x1x32xf32>
    %59 = vector.shape_cast %58 : vector<8x1x32xf32> to vector<8x32xf32>
    %60 = vector.extract_strided_slice %43 {offsets = [0, 8, 0], sizes = [8, 1, 32], strides = [1, 1, 1]} : vector<8x16x32xf32> to vector<8x1x32xf32>
    %61 = vector.shape_cast %60 : vector<8x1x32xf32> to vector<8x32xf32>
    %62 = vector.extract_strided_slice %43 {offsets = [0, 9, 0], sizes = [8, 1, 32], strides = [1, 1, 1]} : vector<8x16x32xf32> to vector<8x1x32xf32>
    %63 = vector.shape_cast %62 : vector<8x1x32xf32> to vector<8x32xf32>
    %64 = vector.extract_strided_slice %43 {offsets = [0, 10, 0], sizes = [8, 1, 32], strides = [1, 1, 1]} : vector<8x16x32xf32> to vector<8x1x32xf32>
    %65 = vector.shape_cast %64 : vector<8x1x32xf32> to vector<8x32xf32>
    %66 = vector.extract_strided_slice %43 {offsets = [0, 11, 0], sizes = [8, 1, 32], strides = [1, 1, 1]} : vector<8x16x32xf32> to vector<8x1x32xf32>
    %67 = vector.shape_cast %66 : vector<8x1x32xf32> to vector<8x32xf32>
    %68 = vector.extract_strided_slice %43 {offsets = [0, 12, 0], sizes = [8, 1, 32], strides = [1, 1, 1]} : vector<8x16x32xf32> to vector<8x1x32xf32>
    %69 = vector.shape_cast %68 : vector<8x1x32xf32> to vector<8x32xf32>
    %70 = vector.extract_strided_slice %43 {offsets = [0, 13, 0], sizes = [8, 1, 32], strides = [1, 1, 1]} : vector<8x16x32xf32> to vector<8x1x32xf32>
    %71 = vector.shape_cast %70 : vector<8x1x32xf32> to vector<8x32xf32>
    %72 = vector.extract_strided_slice %43 {offsets = [0, 14, 0], sizes = [8, 1, 32], strides = [1, 1, 1]} : vector<8x16x32xf32> to vector<8x1x32xf32>
    %73 = vector.shape_cast %72 : vector<8x1x32xf32> to vector<8x32xf32>
    %74 = vector.extract_strided_slice %43 {offsets = [0, 15, 0], sizes = [8, 1, 32], strides = [1, 1, 1]} : vector<8x16x32xf32> to vector<8x1x32xf32>
    %75 = vector.shape_cast %74 : vector<8x1x32xf32> to vector<8x32xf32>
    %76 = tpu.concatenate %45, %47, %49, %51, %53, %55, %57, %59, %61, %63, %65, %67, %69, %71, %73, %75 in 1 : vector<8x32xf32>, vector<8x32xf32>, vector<8x32xf32>, vector<8x32xf32>, vector<8x32xf32>, vector<8x32xf32>, vector<8x32xf32>, vector<8x32xf32>, vector<8x32xf32>, vector<8x32xf32>, vector<8x32xf32>, vector<8x32xf32>, vector<8x32xf32>, vector<8x32xf32>, vector<8x32xf32>, vector<8x32xf32> -> vector<8x512xf32>
    %c0_13 = arith.constant 0 : index
    %c0_14 = arith.constant 0 : index
    %77 = vector.load %arg6[%c0_13, %c0_14] : memref<512x64xf32, #tpu.memory_space<vmem>>, vector<512x64xf32>
    %cst_15 = arith.constant dense<0.000000e+00> : vector<8x64xf32>
    %78 = tpu.matmul %76, %77, %cst_15 {dimension_numbers = #tpu.dot_dimension_numbers<[1], [0], [0], [1], [0, 0, 1, 1], [], []>} : vector<8x512xf32>, vector<512x64xf32>, vector<8x64xf32> -> vector<8x64xf32>
    %c0_16 = arith.constant 0 : index
    %c0_17 = arith.constant 0 : index
    %79 = vector.load %arg7[%c0_16, %c0_17] : memref<1x64xf32, #tpu.memory_space<vmem>>, vector<1x64xf32>
    %80 = vector.broadcast %79 : vector<1x64xf32> to vector<8x64xf32>
    %81 = arith.addf %78, %80 : vector<8x64xf32>
    %cst_18 = arith.constant 0.000000e+00 : f32
    %82 = vector.broadcast %cst_18 : f32 to vector<8x64xf32>
    %83 = arith.maximumf %81, %82 : vector<8x64xf32>
    %c0_19 = arith.constant 0 : index
    %c0_20 = arith.constant 0 : index
    %84 = vector.load %arg8[%c0_19, %c0_20] : memref<1x64xf32, #tpu.memory_space<vmem>>, vector<1x64xf32>
    %85 = vector.broadcast %84 : vector<1x64xf32> to vector<8x64xf32>
    %86 = arith.mulf %83, %85 : vector<8x64xf32>
    %cst_21 = arith.constant dense<0.000000e+00> : vector<8xf32>
    %87 = vector.multi_reduction <add>, %86, %cst_21 [1] : vector<8x64xf32> to vector<8xf32>
    %88 = vector.shape_cast %87 : vector<8xf32> to vector<1x8xf32>
    %c0_22 = arith.constant 0 : index
    %c0_23 = arith.constant 0 : index
    %89 = vector.load %arg9[%c0_22, %c0_23] : memref<1x1xf32, #tpu.memory_space<vmem>>, vector<1x1xf32>
    %90 = vector.broadcast %89 : vector<1x1xf32> to vector<1x8xf32>
    %91 = arith.addf %88, %90 : vector<1x8xf32>
    %c0_24 = arith.constant 0 : index
    %c0_25 = arith.constant 0 : index
    %92 = vector.load %arg10[%c0_24, %c0_25] : memref<1x8xf32, #tpu.memory_space<vmem>>, vector<1x8xf32>
    tpu.vector_store %arg10[%c0_24, %c0_25], %91 {strides = array<i32>} : memref<1x8xf32, #tpu.memory_space<vmem>>, vector<1x8xf32>,
    return
  }
  func.func @transform_0(%arg0: i32) -> (i32, i32) {
    %c0_i32 = arith.constant 0 : i32
    %c0_i32_0 = arith.constant 0 : i32
    return %arg0, %c0_i32 : i32, i32
  }
  func.func @transform_1(%arg0: i32) -> (i32, i32) {
    %c0_i32 = arith.constant 0 : i32
    %c0_i32_0 = arith.constant 0 : i32
    %c0_i32_1 = arith.constant 0 : i32
    return %c0_i32, %c0_i32_0 : i32, i32
  }
  func.func @transform_2(%arg0: i32) -> (i32, i32) {
    %c0_i32 = arith.constant 0 : i32
    %c0_i32_0 = arith.constant 0 : i32
    %c0_i32_1 = arith.constant 0 : i32
    return %c0_i32, %c0_i32_0 : i32, i32
  }
  func.func @transform_3(%arg0: i32) -> (i32, i32) {
    %c0_i32 = arith.constant 0 : i32
    %c0_i32_0 = arith.constant 0 : i32
    %c0_i32_1 = arith.constant 0 : i32
    return %c0_i32, %c0_i32_0 : i32, i32
  }
  func.func @transform_4(%arg0: i32) -> (i32, i32) {
    %c0_i32 = arith.constant 0 : i32
    %c0_i32_0 = arith.constant 0 : i32
    %c0_i32_1 = arith.constant 0 : i32
    return %c0_i32, %c0_i32_0 : i32, i32
  }
  func.func @transform_5(%arg0: i32) -> (i32, i32) {
    %c0_i32 = arith.constant 0 : i32
    %c0_i32_0 = arith.constant 0 : i32
    %c0_i32_1 = arith.constant 0 : i32
    return %c0_i32, %c0_i32_0 : i32, i32
  }
  func.func @transform_6(%arg0: i32) -> (i32, i32) {
    %c0_i32 = arith.constant 0 : i32
    %c0_i32_0 = arith.constant 0 : i32
    %c0_i32_1 = arith.constant 0 : i32
    return %c0_i32, %c0_i32_0 : i32, i32
  }
  func.func @transform_7(%arg0: i32) -> (i32, i32) {
    %c0_i32 = arith.constant 0 : i32
    %c0_i32_0 = arith.constant 0 : i32
    %c0_i32_1 = arith.constant 0 : i32
    return %c0_i32, %c0_i32_0 : i32, i32
  }
  func.func @transform_8(%arg0: i32) -> (i32, i32) {
    %c0_i32 = arith.constant 0 : i32
    %c0_i32_0 = arith.constant 0 : i32
    %c0_i32_1 = arith.constant 0 : i32
    return %c0_i32, %c0_i32_0 : i32, i32
  }
  func.func @transform_9(%arg0: i32) -> (i32, i32) {
    %c0_i32 = arith.constant 0 : i32
    %c0_i32_0 = arith.constant 0 : i32
    return %arg0, %c0_i32 : i32, i32
  }
}

</mosaic_0001>

<bundles_post_ra>
// kernel: tpu_custom_call.1
= control target key start
LH: loop header
LB: loop body
LE: loop exit
PB: predicated region body
PF: predicated region fallthrough
CT: control target
= control target key end

     0   :  { %s3702_s0 = inlined_call_operand.vmem [shape: f32[8,28], index: 0, kind: input, shape index: {}]   ;;  %s3703_s1 = inlined_call_operand.vmem [shape: f32[5,16], index: 1, kind: input, shape index: {}]   ;;  %s3704_s2 = inlined_call_operand.vmem [shape: f32[1,16], index: 2, kind: input, shape index: {}]   ;;  %s3705_s3 = inlined_call_operand.vmem [shape: f32[80,32], index: 3, kind: input, shape index: {}]   ;;  %s3706_s4 = inlined_call_operand.vmem [shape: f32[1,32], index: 4, kind: input, shape index: {}]   ;;  %s3707_s5 = inlined_call_operand.vmem [shape: f32[512,64], index: 5, kind: input, shape index: {}]   ;;  %s3708_s6 = inlined_call_operand.vmem [shape: f32[1,64], index: 6, kind: input, shape index: {}]   ;;  %s3709_s7 = inlined_call_operand.vmem [shape: f32[1,64], index: 7, kind: input, shape index: {}]   ;;  %s3710_s8 = inlined_call_operand.<no memory space> [shape: f32[1,1], index: 8, kind: input, shape index: {}]   ;;  %s3711_s9 = inlined_call_operand.hbm [shape: f32[1,8], index: 9, kind: output, shape index: {}]  }
   0x1   :  { %v14_v0 = vstv %s3710_s8 }
   0x2   :  { %15 = vst [vmem:[#allocation2] sm:$0x1] %v14_v0 }
   0x3   :  { %v36_v1 = vlaneseq }
   0x4   :  { %16 = vsyncpa [#allocation4], 0  ;;  %v2664_v3 = vld [vmem:[%s3702_s0] sm:$0xff]  ;;  %vm721_vm0 = vcmask 1044480   ;;  %vm540_vm1 = vcmask 7168   ;;  %vm565_vm2 = vcmask 15360  }
   0x5   :  { %v2659_v2 = vshrl.u32 %v36_v1, 7  ;;  %v640_v6 = vld [vmem:[%s3703_s1] sm:$0x1f]  ;;  %vm590_vm3 = vcmask 23552   ;;  %vm615_vm4 = vcmask 31744   ;;  %vm648_vm5 = vcmask 39936  }
   0x6   :  { %2369 = vmatprep.subr.msk.mxu0 %vm721_vm0, %v640_v6  ;;  %vm995_vm7 = vcmask 1046528   ;;  %s2598_s17 = smov 16   ;;  %vm1084_vm8 = vcmask 1045504   ;;  %s2599_s22 = smov 32   ;;  %vm1261_vm9 = vcmask 1043456   ;;  %vm1350_vm11 = vcmask 130048  }
   0x7   :  { %v38_v4 = vsub.s32 0, %v2659_v2  ;;  %2370 = vmatpush3.msk.msra.mxu0 %vm721_vm0, %v640_v6  ;;  %v53_v7 = vsub.s32 1, %v2659_v2  ;;  %v68_v9 = vsub.s32 2, %v2659_v2  ;;  %v83_v11 = vsub.s32 3, %v2659_v2  ;;  %s2600_s27 = smov 48   ;;  %s2601_s0 = smov 64  }
   0x8   :  { %v98_v13 = vsub.s32 4, %v2659_v2  ;;  %v113_v35 = vsub.s32 5, %v2659_v2  ;;  %v128_v62 = vsub.s32 6, %v2659_v2  ;;  %vm938_vm6 = vcmp.ge.s32.totalorder %v2659_v2, 2 }
   0x9   :  { %v39_v5 = vrot.slane %v2664_v3, %v38_v4  ;;  %v54_v8 = vrot.slane %v2664_v3, %v53_v7  ;;  %v69_v10 = vrot.slane %v2664_v3, %v68_v9  ;;  %v84_v12 = vrot.slane %v2664_v3, %v83_v11 }
   0xa   :  { %v2683_v14 = vrot.slane %v2664_v3, %v98_v13  ;;  %v114_v38 = vrot.slane %v2664_v3, %v113_v35  ;;  %v2729_v9 = vrot.slane %v2664_v3, %v128_v62  ;;  %vm1367_vm12 = vcmask 261120  }
   0xb   :  { %45 = vbcast.lane.b32.xlu1 %v39_v5, 264  ;;  %41 = vbcast.lane.b32.xlu0 %v39_v5, 256  ;;  %vm1384_vm13 = vcmask 392192   ;;  %vm1401_vm14 = vcmask 523264   ;;  %vm1435_vm15 = vcmask 654336  }
   0xf   :  { %162 = vbcast.lane.b32.xlu1 %v39_v5, 265  ;;  %158 = vbcast.lane.b32.xlu0 %v39_v5, 257 }
  0x13   :  { %258 = vbcast.lane.b32.xlu1 %v39_v5, 266  ;;  %254 = vbcast.lane.b32.xlu0 %v39_v5, 258 }
  0x17   :  { %354 = vbcast.lane.b32.xlu1 %v39_v5, 267  ;;  %350 = vbcast.lane.b32.xlu0 %v39_v5, 259 }
  0x1b   :  { %49 = vbcast.lane.b32.xlu1 %v39_v5, 272  ;;  %446 = vbcast.lane.b32.xlu0 %v39_v5, 260 }
  0x1f   :  { %450 = vbcast.lane.b32.xlu1 %v39_v5, 268  ;;  %166 = vbcast.lane.b32.xlu0 %v39_v5, 273 }
  0x23   :  { %170 = vbcast.lane.b32.xlu1 %v54_v8, 257  ;;  %56 = vbcast.lane.b32.xlu0 %v54_v8, 256 }
  0x27   :  { %266 = vbcast.lane.b32.xlu1 %v54_v8, 258  ;;  %262 = vbcast.lane.b32.xlu0 %v39_v5, 274 }
  0x2b   :  { %362 = vbcast.lane.b32.xlu1 %v54_v8, 259  ;;  %358 = vbcast.lane.b32.xlu0 %v39_v5, 275 }
  0x2f   :  { %60 = vbcast.lane.b32.xlu1 %v54_v8, 264  ;;  %454 = vbcast.lane.b32.xlu0 %v39_v5, 276 }
  0x33   :  { %458 = vbcast.lane.b32.xlu1 %v54_v8, 260  ;;  %174 = vbcast.lane.b32.xlu0 %v54_v8, 265 }
  0x37   :  { %178 = vbcast.lane.b32.xlu1 %v54_v8, 273  ;;  %64 = vbcast.lane.b32.xlu0 %v54_v8, 272 }
  0x3b   :  { %274 = vbcast.lane.b32.xlu1 %v54_v8, 274  ;;  %270 = vbcast.lane.b32.xlu0 %v54_v8, 266 }
  0x3f   :  { %370 = vbcast.lane.b32.xlu1 %v54_v8, 275  ;;  %366 = vbcast.lane.b32.xlu0 %v54_v8, 267 }
  0x43   :  { %71 = vbcast.lane.b32.xlu1 %v69_v10, 256  ;;  %462 = vbcast.lane.b32.xlu0 %v54_v8, 268 }
  0x47   :  { %466 = vbcast.lane.b32.xlu1 %v54_v8, 276  ;;  %182 = vbcast.lane.b32.xlu0 %v69_v10, 257 }
  0x4b   :  { %186 = vbcast.lane.b32.xlu1 %v69_v10, 265  ;;  %75 = vbcast.lane.b32.xlu0 %v69_v10, 264 }
  0x4f   :  { %282 = vbcast.lane.b32.xlu1 %v69_v10, 266  ;;  %278 = vbcast.lane.b32.xlu0 %v69_v10, 258 }
  0x53   :  { %378 = vbcast.lane.b32.xlu1 %v69_v10, 267  ;;  %374 = vbcast.lane.b32.xlu0 %v69_v10, 259 }
  0x57   :  { %79 = vbcast.lane.b32.xlu1 %v69_v10, 272  ;;  %470 = vbcast.lane.b32.xlu0 %v69_v10, 260 }
  0x5b   :  { %474 = vbcast.lane.b32.xlu1 %v69_v10, 268  ;;  %190 = vbcast.lane.b32.xlu0 %v69_v10, 273 }
  0x5f   :  { %194 = vbcast.lane.b32.xlu1 %v84_v12, 257  ;;  %86 = vbcast.lane.b32.xlu0 %v84_v12, 256 }
  0x63   :  { %290 = vbcast.lane.b32.xlu1 %v84_v12, 258  ;;  %286 = vbcast.lane.b32.xlu0 %v69_v10, 274 }
  0x67   :  { %386 = vbcast.lane.b32.xlu1 %v84_v12, 259  ;;  %382 = vbcast.lane.b32.xlu0 %v69_v10, 275 }
  0x6b   :  { %90 = vbcast.lane.b32.xlu1 %v84_v12, 264  ;;  %478 = vbcast.lane.b32.xlu0 %v69_v10, 276 }
  0x6f   :  { %482 = vbcast.lane.b32.xlu1 %v84_v12, 260  ;;  %198 = vbcast.lane.b32.xlu0 %v84_v12, 265 }
  0x73   :  { %202 = vbcast.lane.b32.xlu1 %v84_v12, 273  ;;  %94 = vbcast.lane.b32.xlu0 %v84_v12, 272 }
  0x77   :  { %298 = vbcast.lane.b32.xlu1 %v84_v12, 274  ;;  %294 = vbcast.lane.b32.xlu0 %v84_v12, 266 }
  0x7b   :  { %394 = vbcast.lane.b32.xlu1 %v84_v12, 275  ;;  %390 = vbcast.lane.b32.xlu0 %v84_v12, 267 }
  0x7d   :  { %v46_v15 = vpop.permute.xlu1 %45  ;;  %v42_v16 = vpop.permute.xlu0 %41 }
  0x7f   :  { %101 = vbcast.lane.b32.xlu1 %v2683_v14, 256  ;;  %486 = vbcast.lane.b32.xlu0 %v84_v12, 268 }
  0x81   :  { %v163_v17 = vpop.permute.xlu1 %162  ;;  %v159_v18 = vpop.permute.xlu0 %158 }
  0x82   :  { %v541_v23 = vsel %vm540_vm1, %v42_v16, %v159_v18  ;;  %v542_v29 = vsel %vm540_vm1, %v46_v15, %v163_v17 }
  0x83   :  { %490 = vbcast.lane.b32.xlu1 %v84_v12, 276  ;;  %206 = vbcast.lane.b32.xlu0 %v2683_v14, 257 }
  0x85   :  { %v259_v19 = vpop.permute.xlu1 %258  ;;  %v255_v20 = vpop.permute.xlu0 %254 }
  0x86   :  { %v566_v24 = vsel %vm565_vm2, %v541_v23, %v255_v20  ;;  %v567_v30 = vsel %vm565_vm2, %v542_v29, %v259_v19 }
  0x87   :  { %210 = vbcast.lane.b32.xlu1 %v2683_v14, 265  ;;  %105 = vbcast.lane.b32.xlu0 %v2683_v14, 264 }
  0x89   :  { %v355_v21 = vpop.permute.xlu1 %354  ;;  %v351_v22 = vpop.permute.xlu0 %350 }
  0x8a   :  { %v591_v25 = vsel %vm590_vm3, %v566_v24, %v351_v22  ;;  %v592_v31 = vsel %vm590_vm3, %v567_v30, %v355_v21 }
  0x8b   :  { %306 = vbcast.lane.b32.xlu1 %v2683_v14, 266  ;;  %302 = vbcast.lane.b32.xlu0 %v2683_v14, 258 }
  0x8d   :  { %v50_v26 = vpop.permute.xlu1 %49  ;;  %v447_v27 = vpop.permute.xlu0 %446 }
  0x8e   :  { %v616_v28 = vsel %vm615_vm4, %v591_v25, %v447_v27 }
  0x8f   :  { %402 = vbcast.lane.b32.xlu1 %v2683_v14, 267  ;;  %398 = vbcast.lane.b32.xlu0 %v2683_v14, 259 }
  0x90   :  { %2371 = vmatprep.mubr.msk.f32.mxu0 %vm648_vm5, %v616_v28 }
  0x91   :  { %v451_v32 = vpop.permute.xlu1 %450  ;;  %v167_v33 = vpop.permute.xlu0 %166 }
  0x92   :  { %v617_v34 = vsel %vm615_vm4, %v592_v31, %v451_v32  ;;  %v543_v43 = vsel %vm540_vm1, %v50_v26, %v167_v33  ;;  %v143_v33 = vsub.s32 7, %v2659_v2 }
  0x93   :  { %109 = vbcast.lane.b32.xlu1 %v2683_v14, 272  ;;  %494 = vbcast.lane.b32.xlu0 %v2683_v14, 260 }
  0x94   :  { %2372 = vmatmul.mubr.msk.f32.vlgmr.msra.gmra.mrb[0].mxu0 %vm648_vm5, %v617_v34 }
  0x95   :  { %v171_v36 = vpop.permute.xlu1 %170  ;;  %v57_v37 = vpop.permute.xlu0 %56 }
  0x96   :  { %v544_v49 = vsel %vm540_vm1, %v57_v37, %v171_v36  ;;  %v144_v36 = vrot.slane %v2664_v3, %v143_v33 }
  0x97   :  { %498 = vbcast.lane.b32.xlu1 %v2683_v14, 268  ;;  %214 = vbcast.lane.b32.xlu0 %v2683_v14, 273 }
  0x99   :  { %v267_v39 = vpop.permute.xlu1 %266  ;;  %v263_v40 = vpop.permute.xlu0 %262 }
  0x9a   :  { %v568_v44 = vsel %vm565_vm2, %v543_v43, %v263_v40  ;;  %v569_v50 = vsel %vm565_vm2, %v544_v49, %v267_v39 }
  0x9b   :  { %218 = vbcast.lane.b32.xlu1 %v114_v38, 257  ;;  %116 = vbcast.lane.b32.xlu0 %v114_v38, 256 }
  0x9d   :  { %v363_v41 = vpop.permute.xlu1 %362  ;;  %v359_v42 = vpop.permute.xlu0 %358 }
  0x9e   :  { %v593_v45 = vsel %vm590_vm3, %v568_v44, %v359_v42  ;;  %v594_v51 = vsel %vm590_vm3, %v569_v50, %v363_v41 }
  0x9f   :  { %314 = vbcast.lane.b32.xlu1 %v114_v38, 258  ;;  %310 = vbcast.lane.b32.xlu0 %v2683_v14, 274 }
  0xa1   :  { %v61_v46 = vpop.permute.xlu1 %60  ;;  %v455_v47 = vpop.permute.xlu0 %454 }
  0xa2   :  { %v618_v48 = vsel %vm615_vm4, %v593_v45, %v455_v47 }
  0xa3   :  { %410 = vbcast.lane.b32.xlu1 %v114_v38, 259  ;;  %406 = vbcast.lane.b32.xlu0 %v2683_v14, 275 }
  0xa4   :  { %2374 = vmatprep.mubr.msk.f32.mxu0 %vm648_vm5, %v618_v48 }
  0xa5   :  { %v459_v52 = vpop.permute.xlu1 %458  ;;  %v175_v53 = vpop.permute.xlu0 %174 }
  0xa6   :  { %v619_v54 = vsel %vm615_vm4, %v594_v51, %v459_v52  ;;  %v545_v61 = vsel %vm540_vm1, %v61_v46, %v175_v53 }
  0xa7   :  { %120 = vbcast.lane.b32.xlu1 %v114_v38, 264  ;;  %502 = vbcast.lane.b32.xlu0 %v2683_v14, 276 }
  0xa8   :  { %2375 = vmatmul.mubr.msk.f32.gmra.mrb[2].mxu0 %vm648_vm5, %v619_v54 }
  0xa9   :  { %v179_v55 = vpop.permute.xlu1 %178  ;;  %v65_v56 = vpop.permute.xlu0 %64 }
  0xaa   :  { %v546_v8 = vsel %vm540_vm1, %v65_v56, %v179_v55 }
  0xab   :  { %506 = vbcast.lane.b32.xlu1 %v114_v38, 260  ;;  %222 = vbcast.lane.b32.xlu0 %v114_v38, 265 }
  0xad   :  { %v275_v57 = vpop.permute.xlu1 %274  ;;  %v271_v58 = vpop.permute.xlu0 %270 }
  0xae   :  { %v570_v63 = vsel %vm565_vm2, %v545_v61, %v271_v58  ;;  %v571_v10 = vsel %vm565_vm2, %v546_v8, %v275_v57 }
  0xaf   :  { %226 = vbcast.lane.b32.xlu1 %v114_v38, 273  ;;  %124 = vbcast.lane.b32.xlu0 %v114_v38, 272 }
  0xb1   :  { %v371_v59 = vpop.permute.xlu1 %370  ;;  %v367_v60 = vpop.permute.xlu0 %366 }
  0xb2   :  { %v595_v0 = vsel %vm590_vm3, %v570_v63, %v367_v60  ;;  %v596_v11 = vsel %vm590_vm3, %v571_v10, %v371_v59 }
  0xb3   :  { %322 = vbcast.lane.b32.xlu1 %v114_v38, 274  ;;  %318 = vbcast.lane.b32.xlu0 %v114_v38, 266 }
  0xb5   :  { %v72_v5 = vpop.permute.xlu1 %71  ;;  %v463_v6 = vpop.permute.xlu0 %462 }
  0xb6   :  { %v620_v7 = vsel %vm615_vm4, %v595_v0, %v463_v6 }
  0xb7   :  { %418 = vbcast.lane.b32.xlu1 %v114_v38, 275  ;;  %414 = vbcast.lane.b32.xlu0 %v114_v38, 267 }
  0xb8   :  { %2377 = vmatprep.mubr.msk.f32.mxu0 %vm648_vm5, %v620_v7 }
  0xb9   :  { %v467_v12 = vpop.permute.xlu1 %466  ;;  %v183_v13 = vpop.permute.xlu0 %182 }
  0xba   :  { %v621_v14 = vsel %vm615_vm4, %v596_v11, %v467_v12  ;;  %v547_v21 = vsel %vm540_vm1, %v72_v5, %v183_v13 }
  0xbb   :  { %131 = vbcast.lane.b32.xlu1 %v2729_v9, 256  ;;  %510 = vbcast.lane.b32.xlu0 %v114_v38, 268 }
  0xbc   :  { %2378 = vmatmul.mubr.msk.f32.gmra.mrb[4].mxu0 %vm648_vm5, %v621_v14 }
  0xbd   :  { %v187_v15 = vpop.permute.xlu1 %186  ;;  %v76_v16 = vpop.permute.xlu0 %75 }
  0xbe   :  { %v548_v27 = vsel %vm540_vm1, %v76_v16, %v187_v15 }
  0xbf   :  { %514 = vbcast.lane.b32.xlu1 %v114_v38, 276  ;;  %230 = vbcast.lane.b32.xlu0 %v2729_v9, 257 }
  0xc1   :  { %v283_v17 = vpop.permute.xlu1 %282  ;;  %v279_v18 = vpop.permute.xlu0 %278 }
  0xc2   :  { %v572_v22 = vsel %vm565_vm2, %v547_v21, %v279_v18  ;;  %v573_v28 = vsel %vm565_vm2, %v548_v27, %v283_v17 }
  0xc3   :  { %234 = vbcast.lane.b32.xlu1 %v2729_v9, 265  ;;  %135 = vbcast.lane.b32.xlu0 %v2729_v9, 264 }
  0xc5   :  { %v379_v19 = vpop.permute.xlu1 %378  ;;  %v375_v20 = vpop.permute.xlu0 %374 }
  0xc6   :  { %v597_v23 = vsel %vm590_vm3, %v572_v22, %v375_v20  ;;  %v598_v29 = vsel %vm590_vm3, %v573_v28, %v379_v19 }
  0xc7   :  { %330 = vbcast.lane.b32.xlu1 %v2729_v9, 266  ;;  %326 = vbcast.lane.b32.xlu0 %v2729_v9, 258 }
  0xc9   :  { %v80_v24 = vpop.permute.xlu1 %79  ;;  %v471_v25 = vpop.permute.xlu0 %470 }
  0xca   :  { %v622_v26 = vsel %vm615_vm4, %v597_v23, %v471_v25 }
  0xcb   :  { %426 = vbcast.lane.b32.xlu1 %v2729_v9, 267  ;;  %422 = vbcast.lane.b32.xlu0 %v2729_v9, 259 }
  0xcc   :  { %2380 = vmatprep.mubr.msk.f32.mxu0 %vm648_vm5, %v622_v26 }
  0xcd   :  { %v475_v30 = vpop.permute.xlu1 %474  ;;  %v191_v31 = vpop.permute.xlu0 %190 }
  0xce   :  { %v623_v32 = vsel %vm615_vm4, %v598_v29, %v475_v30  ;;  %v549_v41 = vsel %vm540_vm1, %v80_v24, %v191_v31 }
  0xcf   :  { %139 = vbcast.lane.b32.xlu1 %v2729_v9, 272  ;;  %518 = vbcast.lane.b32.xlu0 %v2729_v9, 260 }
  0xd0   :  { %2381 = vmatmul.mubr.msk.f32.gmra.mrb[6].mxu0 %vm648_vm5, %v623_v32 }
  0xd1   :  { %v195_v34 = vpop.permute.xlu1 %194  ;;  %v87_v35 = vpop.permute.xlu0 %86 }
  0xd2   :  { %v550_v3 = vsel %vm540_vm1, %v87_v35, %v195_v34 }
  0xd3   :  { %522 = vbcast.lane.b32.xlu1 %v2729_v9, 268  ;;  %238 = vbcast.lane.b32.xlu0 %v2729_v9, 273 }
  0xd5   :  { %v291_v37 = vpop.permute.xlu1 %290  ;;  %v287_v38 = vpop.permute.xlu0 %286 }
  0xd6   :  { %v574_v42 = vsel %vm565_vm2, %v549_v41, %v287_v38  ;;  %v575_v47 = vsel %vm565_vm2, %v550_v3, %v291_v37 }
  0xd7   :  { %242 = vbcast.lane.b32.xlu1 %v144_v36, 257  ;;  %146 = vbcast.lane.b32.xlu0 %v144_v36, 256 }
  0xd9   :  { %v387_v39 = vpop.permute.xlu1 %386  ;;  %v383_v40 = vpop.permute.xlu0 %382 }
  0xda   :  { %v599_v43 = vsel %vm590_vm3, %v574_v42, %v383_v40  ;;  %v600_v48 = vsel %vm590_vm3, %v575_v47, %v387_v39 }
  0xdb   :  { %338 = vbcast.lane.b32.xlu1 %v144_v36, 258  ;;  %334 = vbcast.lane.b32.xlu0 %v2729_v9, 274 }
  0xdd   :  { %v91_v44 = vpop.permute.xlu1 %90  ;;  %v479_v45 = vpop.permute.xlu0 %478 }
  0xde   :  { %v624_v46 = vsel %vm615_vm4, %v599_v43, %v479_v45 }
  0xdf   :  { %434 = vbcast.lane.b32.xlu1 %v144_v36, 259  ;;  %430 = vbcast.lane.b32.xlu0 %v2729_v9, 275 }
  0xe0   :  { %2383 = vmatprep.mubr.msk.f32.mxu0 %vm648_vm5, %v624_v46 }
  0xe1   :  { %v483_v49 = vpop.permute.xlu1 %482  ;;  %v199_v50 = vpop.permute.xlu0 %198 }
  0xe2   :  { %v625_v51 = vsel %vm615_vm4, %v600_v48, %v483_v49  ;;  %v551_v58 = vsel %vm540_vm1, %v91_v44, %v199_v50 }
  0xe3   :  { %150 = vbcast.lane.b32.xlu1 %v144_v36, 264  ;;  %526 = vbcast.lane.b32.xlu0 %v2729_v9, 276 }
  0xe4   :  { %2384 = vmatmul.mubr.msk.f32.gmra.mrb[8].mxu0 %vm648_vm5, %v625_v51 }
  0xe5   :  { %v203_v52 = vpop.permute.xlu1 %202  ;;  %v95_v53 = vpop.permute.xlu0 %94 }
  0xe6   :  { %v552_v0 = vsel %vm540_vm1, %v95_v53, %v203_v52 }
  0xe7   :  { %530 = vbcast.lane.b32.xlu1 %v144_v36, 260  ;;  %246 = vbcast.lane.b32.xlu0 %v144_v36, 265 }
  0xe9   :  { %v299_v54 = vpop.permute.xlu1 %298  ;;  %v295_v55 = vpop.permute.xlu0 %294 }
  0xea   :  { %v576_v59 = vsel %vm565_vm2, %v551_v58, %v295_v55  ;;  %v577_v5 = vsel %vm565_vm2, %v552_v0, %v299_v54 }
  0xeb   :  { %250 = vbcast.lane.b32.xlu1 %v144_v36, 273  ;;  %154 = vbcast.lane.b32.xlu0 %v144_v36, 272 }
  0xed   :  { %v395_v56 = vpop.permute.xlu1 %394  ;;  %v391_v57 = vpop.permute.xlu0 %390 }
  0xee   :  { %v601_v60 = vsel %vm590_vm3, %v576_v59, %v391_v57  ;;  %v602_v6 = vsel %vm590_vm3, %v577_v5, %v395_v56 }
  0xef   :  { %346 = vbcast.lane.b32.xlu1 %v144_v36, 274  ;;  %342 = vbcast.lane.b32.xlu0 %v144_v36, 266 }
  0xf1   :  { %v102_v61 = vpop.permute.xlu1 %101  ;;  %v487_v62 = vpop.permute.xlu0 %486 }
  0xf2   :  { %v626_v63 = vsel %vm615_vm4, %v601_v60, %v487_v62 }
  0xf3   :  { %442 = vbcast.lane.b32.xlu1 %v144_v36, 275  ;;  %438 = vbcast.lane.b32.xlu0 %v144_v36, 267 }
  0xf4   :  { %2386 = vmatprep.mubr.msk.f32.mxu0 %vm648_vm5, %v626_v63 }
  0xf5   :  { %v491_v7 = vpop.permute.xlu1 %490  ;;  %v207_v8 = vpop.permute.xlu0 %206 }
  0xf6   :  { %v627_v9 = vsel %vm615_vm4, %v602_v6, %v491_v7  ;;  %v553_v16 = vsel %vm540_vm1, %v102_v61, %v207_v8 }
  0xf7   :  { %538 = vbcast.lane.b32.xlu1 %v144_v36, 276  ;;  %534 = vbcast.lane.b32.xlu0 %v144_v36, 268 }
  0xf8   :  { %2387 = vmatmul.mubr.msk.f32.gmra.mrb[10].mxu0 %vm648_vm5, %v627_v9 }
  0xf9   :  { %v211_v10 = vpop.permute.xlu1 %210  ;;  %v106_v11 = vpop.permute.xlu0 %105 }
  0xfa   :  { %v554_v22 = vsel %vm540_vm1, %v106_v11, %v211_v10 }
  0xfd   :  { %v307_v12 = vpop.permute.xlu1 %306  ;;  %v303_v13 = vpop.permute.xlu0 %302 }
  0xfe   :  { %v578_v17 = vsel %vm565_vm2, %v553_v16, %v303_v13  ;;  %v579_v23 = vsel %vm565_vm2, %v554_v22, %v307_v12 }
 0x101   :  { %v403_v14 = vpop.permute.xlu1 %402  ;;  %v399_v15 = vpop.permute.xlu0 %398 }
 0x102   :  { %v603_v18 = vsel %vm590_vm3, %v578_v17, %v399_v15  ;;  %v604_v24 = vsel %vm590_vm3, %v579_v23, %v403_v14 }
 0x105   :  { %v110_v19 = vpop.permute.xlu1 %109  ;;  %v495_v20 = vpop.permute.xlu0 %494 }
 0x106   :  { %v628_v21 = vsel %vm615_vm4, %v603_v18, %v495_v20 }
 0x107   :  { %2389 = vmatprep.mubr.msk.f32.mxu0 %vm648_vm5, %v628_v21 }
 0x109   :  { %v499_v25 = vpop.permute.xlu1 %498  ;;  %v215_v26 = vpop.permute.xlu0 %214 }
 0x10a   :  { %v629_v27 = vsel %vm615_vm4, %v604_v24, %v499_v25  ;;  %v555_v34 = vsel %vm540_vm1, %v110_v19, %v215_v26 }
 0x10b   :  { %2390 = vmatmul.mubr.msk.f32.gmra.mrb[12].mxu0 %vm648_vm5, %v629_v27 }
 0x10d   :  { %v219_v28 = vpop.permute.xlu1 %218  ;;  %v117_v29 = vpop.permute.xlu0 %116 }
 0x10e   :  { %v556_v40 = vsel %vm540_vm1, %v117_v29, %v219_v28 }
 0x111   :  { %v315_v30 = vpop.permute.xlu1 %314  ;;  %v311_v31 = vpop.permute.xlu0 %310 }
 0x112   :  { %v580_v35 = vsel %vm565_vm2, %v555_v34, %v311_v31  ;;  %v581_v41 = vsel %vm565_vm2, %v556_v40, %v315_v30 }
 0x115   :  { %v411_v32 = vpop.permute.xlu1 %410  ;;  %v407_v33 = vpop.permute.xlu0 %406 }
 0x116   :  { %v605_v36 = vsel %vm590_vm3, %v580_v35, %v407_v33  ;;  %v606_v42 = vsel %vm590_vm3, %v581_v41, %v411_v32 }
 0x119   :  { %v121_v37 = vpop.permute.xlu1 %120  ;;  %v503_v38 = vpop.permute.xlu0 %502 }
 0x11a   :  { %v630_v39 = vsel %vm615_vm4, %v605_v36, %v503_v38 }
 0x11b   :  { %2392 = vmatprep.mubr.msk.f32.mxu0 %vm648_vm5, %v630_v39 }
 0x11d   :  { %v507_v43 = vpop.permute.xlu1 %506  ;;  %v223_v44 = vpop.permute.xlu0 %222 }
 0x11e   :  { %v631_v45 = vsel %vm615_vm4, %v606_v42, %v507_v43  ;;  %v557_v51 = vsel %vm540_vm1, %v121_v37, %v223_v44 }
 0x11f   :  { %2393 = vmatmul.mubr.msk.f32.gmra.mrb[14].mxu0 %vm648_vm5, %v631_v45  ;;  %v2836_v45 = vld [vmem:[%s3704_s2] ss:$0 sm:$0xff] }
 0x121   :  { %v227_v46 = vpop.permute.xlu1 %226  ;;  %v125_v3 = vpop.permute.xlu0 %124 }
 0x122   :  { %v558_v57 = vsel %vm540_vm1, %v125_v3, %v227_v46 }
 0x125   :  { %v323_v47 = vpop.permute.xlu1 %322  ;;  %v319_v48 = vpop.permute.xlu0 %318 }
 0x126   :  { %v582_v52 = vsel %vm565_vm2, %v557_v51, %v319_v48  ;;  %v583_v58 = vsel %vm565_vm2, %v558_v57, %v323_v47 }
 0x129   :  { %v419_v49 = vpop.permute.xlu1 %418  ;;  %v415_v50 = vpop.permute.xlu0 %414 }
 0x12a   :  { %v607_v53 = vsel %vm590_vm3, %v582_v52, %v415_v50  ;;  %v608_v59 = vsel %vm590_vm3, %v583_v58, %v419_v49 }
 0x12d   :  { %v132_v54 = vpop.permute.xlu1 %131  ;;  %v511_v55 = vpop.permute.xlu0 %510 }
 0x12e   :  { %v632_v56 = vsel %vm615_vm4, %v607_v53, %v511_v55 }
 0x12f   :  { %2395 = vmatprep.mubr.msk.f32.mxu0 %vm648_vm5, %v632_v56 }
 0x131   :  { %v515_v60 = vpop.permute.xlu1 %514  ;;  %v231_v61 = vpop.permute.xlu0 %230 }
 0x132   :  { %v633_v62 = vsel %vm615_vm4, %v608_v59, %v515_v60  ;;  %v559_v9 = vsel %vm540_vm1, %v132_v54, %v231_v61  ;;  %v1418_v61 = vld [vmem:[%s3705_s3] sm:$0xff] }
 0x133   :  { %2396 = vmatmul.mubr.msk.f32.gmra.mrb[16].mxu0 %vm648_vm5, %v633_v62  ;;  %v1419_v62 = vld [vmem:[%s3705_s3 + $0x8] sm:$0xff] }
 0x135   :  { %v235_v63 = vpop.permute.xlu1 %234  ;;  %v136_v0 = vpop.permute.xlu0 %135 }
 0x136   :  { %v560_v15 = vsel %vm540_vm1, %v136_v0, %v235_v63  ;;  %v2451_v0 = vpack.c.bf16 %v1419_v62, %v1418_v61 }
 0x138   :  { %2452 = vmatprep.subr.bf16.mxu1 %v2451_v0 }
 0x139   :  { %v331_v5 = vpop.permute.xlu1 %330  ;;  %v327_v6 = vpop.permute.xlu0 %326  ;;  %2454 = vmatpush3.bf16.msra.mxu1 %v2451_v0 }
 0x13a   :  { %v584_v10 = vsel %vm565_vm2, %v559_v9, %v327_v6  ;;  %v585_v16 = vsel %vm565_vm2, %v560_v15, %v331_v5  ;;  %v1420_v9 = vld [vmem:[%s3705_s3 + $0x10] sm:$0xff] }
 0x13d   :  { %v427_v7 = vpop.permute.xlu1 %426  ;;  %v423_v8 = vpop.permute.xlu0 %422 }
 0x13e   :  { %v609_v11 = vsel %vm590_vm3, %v584_v10, %v423_v8  ;;  %v610_v17 = vsel %vm590_vm3, %v585_v16, %v427_v7  ;;  %v1421_v10 = vld [vmem:[%s3705_s3 + $0x18] sm:$0xff]  ;;  %v1422_v16 = vld [vmem:[%s3705_s3 + $0x20] sm:$0xff] }
 0x141   :  { %v140_v12 = vpop.permute.xlu1 %139  ;;  %v519_v13 = vpop.permute.xlu0 %518 }
 0x142   :  { %v634_v14 = vsel %vm615_vm4, %v609_v11, %v519_v13 }
 0x143   :  { %2398 = vmatprep.mubr.msk.f32.mxu0 %vm648_vm5, %v634_v14 }
 0x145   :  { %v523_v18 = vpop.permute.xlu1 %522  ;;  %v239_v19 = vpop.permute.xlu0 %238 }
 0x146   :  { %v635_v20 = vsel %vm615_vm4, %v610_v17, %v523_v18  ;;  %v561_v27 = vsel %vm540_vm1, %v140_v12, %v239_v19  ;;  %v2455_v12 = vpack.c.bf16 %v1421_v10, %v1420_v9  ;;  %v1423_v17 = vld [vmem:[%s3705_s3 + $0x28] sm:$0xff] }
 0x147   :  { %2399 = vmatmul.mubr.msk.f32.gmra.mrb[18].mxu0 %vm648_vm5, %v635_v20  ;;  %v2459_v18 = vpack.c.bf16 %v1423_v17, %v1422_v16 }
 0x148   :  { %2456 = vmatprep.subr.bf16.mxu1 %v2455_v12 }
 0x149   :  { %v243_v21 = vpop.permute.xlu1 %242  ;;  %v147_v22 = vpop.permute.xlu0 %146  ;;  %2458 = vmatpush3.bf16.msra.mxu1 %v2455_v12 }
 0x14a   :  { %v562_v33 = vsel %vm540_vm1, %v147_v22, %v243_v21  ;;  %2460 = vmatprep.subr.bf16.mxu1 %v2459_v18  ;;  %v1424_v21 = vld [vmem:[%s3705_s3 + $0x30] sm:$0xff]  ;;  %v1425_v22 = vld [vmem:[%s3705_s3 + $0x38] sm:$0xff] }
 0x14d   :  { %v339_v23 = vpop.permute.xlu1 %338  ;;  %v335_v24 = vpop.permute.xlu0 %334  ;;  %2462 = vmatpush3.bf16.msra.mxu1 %v2459_v18 }
 0x14e   :  { %v586_v28 = vsel %vm565_vm2, %v561_v27, %v335_v24  ;;  %v587_v34 = vsel %vm565_vm2, %v562_v33, %v339_v23  ;;  %v2895_v23 = vadd.s32 16, %v2659_v2 }
 0x150   :  { %vm943_vm10 = vcmp.lt.s32.totalorder %v2895_v23, 18 }
 0x151   :  { %v435_v25 = vpop.permute.xlu1 %434  ;;  %v431_v26 = vpop.permute.xlu0 %430 }
 0x152   :  { %v611_v29 = vsel %vm590_vm3, %v586_v28, %v431_v26  ;;  %v612_v35 = vsel %vm590_vm3, %v587_v34, %v435_v25  ;;  %v2463_v25 = vpack.c.bf16 %v1425_v22, %v1424_v21 }
 0x154   :  { %2464 = vmatprep.subr.bf16.mxu1 %v2463_v25 }
 0x155   :  { %v151_v30 = vpop.permute.xlu1 %150  ;;  %v527_v31 = vpop.permute.xlu0 %526  ;;  %2466 = vmatpush3.bf16.msra.mxu1 %v2463_v25 }
 0x156   :  { %v636_v32 = vsel %vm615_vm4, %v611_v29, %v527_v31  ;;  %v1426_v29 = vld [vmem:[%s3705_s3 + $0x40] sm:$0xff] }
 0x157   :  { %2401 = vmatprep.mubr.msk.f32.mxu0 %vm648_vm5, %v636_v32 }
 0x159   :  { %v531_v36 = vpop.permute.xlu1 %530  ;;  %v247_v37 = vpop.permute.xlu0 %246 }
 0x15a   :  { %v637_v38 = vsel %vm615_vm4, %v612_v35, %v531_v36  ;;  %v563_v46 = vsel %vm540_vm1, %v151_v30, %v247_v37  ;;  %v1427_v30 = vld [vmem:[%s3705_s3 + $0x48] sm:$0xff] }
 0x15b   :  { %2402 = vmatmul.mubr.msk.f32.gmra.mrb[20].mxu0 %vm648_vm5, %v637_v38  ;;  %v2467_v32 = vpack.c.bf16 %v1427_v30, %v1426_v29 }
 0x15d   :  { %v251_v39 = vpop.permute.xlu1 %250  ;;  %v155_v40 = vpop.permute.xlu0 %154  ;;  %2468 = vmatprep.subr.bf16.mxu1 %v2467_v32 }
 0x15e   :  { %v564_v3 = vsel %vm540_vm1, %v155_v40, %v251_v39  ;;  %2470 = vmatpush3.bf16.msra.mxu1 %v2467_v32  ;;  %vm1657_vm1 = vcmask 1042434  }
 0x161   :  { %v347_v41 = vpop.permute.xlu1 %346  ;;  %v343_v42 = vpop.permute.xlu0 %342 }
 0x162   :  { %v589_v48 = vsel %vm565_vm2, %v564_v3, %v347_v41  ;;  %v588_v49 = vsel %vm565_vm2, %v563_v46, %v343_v42  ;;  %vm1660_vm2 = vcmask 1043459  }
 0x165   :  { %v443_v43 = vpop.permute.xlu1 %442  ;;  %v439_v44 = vpop.permute.xlu0 %438 }
 0x166   :  { %v614_v52 = vsel %vm590_vm3, %v589_v48, %v443_v43  ;;  %v613_v53 = vsel %vm590_vm3, %v588_v49, %v439_v44  ;;  %vm1663_vm3 = vcmask 1044484  }
 0x167   :  { %v2373_v47 = vpop.f32.mrb[0].mxu0 }
 0x168   :  { %v797_v50 = vadd.f32 %v2373_v47, %v2836_v45  ;;  %v791_v51 = vpop.f32.mrb[1].mxu0 }
 0x169   :  { %v792_v54 = vadd.f32 %v2836_v45, %v791_v51  ;;  %v539_v55 = vpop.permute.xlu1 %538  ;;  %v535_v56 = vpop.permute.xlu0 %534 }
 0x16a   :  { %v2846_v57 = vmax.f32 %v797_v50, 0.0  ;;  %v639_v58 = vsel %vm615_vm4, %v614_v52, %v539_v55  ;;  %v638_v59 = vsel %vm615_vm4, %v613_v53, %v535_v56  ;;  %vm1666_vm4 = vcmask 1045509  }
 0x16b   :  { %v910_v60 = vmax.f32 %v792_v54, 0.0  ;;  %2404 = vmatprep.mubr.msk.f32.mxu0 %vm648_vm5, %v638_v59 }
 0x16c   :  { %2405 = vmatmul.mubr.msk.f32.gmra.mrb[22].mxu0 %vm648_vm5, %v639_v58  ;;  %v997_v6 = vrot.slane %v2846_v57, 1  ;;  %v1086_v11 = vrot.slane %v2846_v57, 2  ;;  %v1174_v15 = vrot.slane %v2846_v57, 3  ;;  %v1263_v24 = vrot.slane %v2846_v57, 4 }
 0x16d   :  { %v2861_v63 = vsel %vm938_vm6, %v910_v60, 0.0  ;;  %vm1669_vm5 = vcmask 1046534  }
 0x16e   :  { %v996_v5 = vrot.slane %v2861_v63, 1  ;;  %v1085_v8 = vrot.slane %v2861_v63, 2  ;;  %v1173_v14 = vrot.slane %v2861_v63, 3  ;;  %v1262_v20 = vrot.slane %v2861_v63, 4 }
 0x170   :  { %v998_v7 = vsel %vm995_vm7, %v996_v5, %v997_v6  ;;  %v1087_v13 = vsel %vm1084_vm8, %v1085_v8, %v1086_v11  ;;  %v1175_v19 = vsel %vm721_vm0, %v1173_v14, %v1174_v15  ;;  %v1264_v28 = vsel %vm1261_vm9, %v1262_v20, %v1263_v24 }
 0x171   :  { %1036 = vrot.lane.b32.xlu0 %v998_v7, %s2598_s17 }
 0x175   :  { %1125 = vrot.lane.b32.xlu0 %v1087_v13, %s2599_s22 }
 0x179   :  { %1213 = vrot.lane.b32.xlu0 %v1175_v19, %s2600_s27 }
 0x17b   :  { %v2376_v26 = vpop.f32.mrb[2].mxu0 }
 0x17c   :  { %v801_v27 = vpop.f32.mrb[3].mxu0  ;;  %v807_v42 = vadd.f32 %v2376_v26, %v2836_v45 }
 0x17d   :  { %v802_v31 = vadd.f32 %v2836_v45, %v801_v27  ;;  %1302 = vrot.lane.b32.xlu0 %v1264_v28, %s2601_s0 }
 0x17e   :  { %v913_v44 = vmax.f32 %v807_v42, 0.0 }
 0x17f   :  { %v912_v33 = vmax.f32 %v802_v31, 0.0 }
 0x180   :  { %v2923_v50 = vsel %vm938_vm6, %v913_v44, 0.0 }
 0x181   :  { %v949_v34 = vsel %vm943_vm10, %v912_v33, 0.0  ;;  %v1001_v53 = vrot.slane %v2923_v50, 1  ;;  %v1090_v55 = vrot.slane %v2923_v50, 2  ;;  %v1178_v62 = vrot.slane %v2923_v50, 3 }
 0x182   :  { %v999_v35 = vrot.slane %v949_v34, 1  ;;  %v1265_v36 = vrot.slane %v949_v34, 4  ;;  %v1088_v37 = vrot.slane %v949_v34, 2  ;;  %v1176_v40 = vrot.slane %v949_v34, 3 }
 0x183   :  { %v1267_v8 = vrot.slane %v2923_v50, 4 }
 0x184   :  { %v1000_v38 = vsel %vm995_vm7, %v997_v6, %v999_v35  ;;  %v1266_v39 = vsel %vm1261_vm9, %v1263_v24, %v1265_v36  ;;  %v1089_v41 = vsel %vm1084_vm8, %v1086_v11, %v1088_v37  ;;  %v1177_v43 = vsel %vm721_vm0, %v1174_v15, %v1176_v40 }
 0x185   :  { %1038 = vrot.lane.b32.xlu1 %v1000_v38, %s2598_s17  ;;  %1304 = vrot.lane.b32.xlu0 %v1266_v39, %s2601_s0 }
 0x189   :  { %1127 = vrot.lane.b32.xlu1 %v1089_v41, %s2599_s22 }
 0x18d   :  { %1215 = vrot.lane.b32.xlu1 %v1177_v43, %s2600_s27 }
 0x18f   :  { %v2379_v46 = vpop.f32.mrb[4].mxu0 }
 0x190   :  { %v817_v3 = vadd.f32 %v2379_v46, %v2836_v45  ;;  %v811_v47 = vpop.f32.mrb[5].mxu0 }
 0x191   :  { %v812_v48 = vadd.f32 %v2836_v45, %v811_v47 }
 0x192   :  { %v915_v49 = vmax.f32 %v817_v3, 0.0 }
 0x193   :  { %v2925_v51 = vmax.f32 %v812_v48, 0.0 }
 0x194   :  { %v952_v52 = vsel %vm943_vm10, %v915_v49, 0.0 }
 0x195   :  { %v1002_v54 = vrot.slane %v2925_v51, 1  ;;  %v1091_v56 = vrot.slane %v2925_v51, 2  ;;  %v1004_v58 = vrot.slane %v952_v52, 1  ;;  %v1179_v61 = vrot.slane %v2925_v51, 3 }
 0x196   :  { %v1093_v0 = vrot.slane %v952_v52, 2  ;;  %v1268_v7 = vrot.slane %v2925_v51, 4  ;;  %v1181_v9 = vrot.slane %v952_v52, 3  ;;  %v1270_v10 = vrot.slane %v952_v52, 4 }
 0x197   :  { %v1003_v59 = vsel %vm995_vm7, %v1001_v53, %v1002_v54  ;;  %v1092_v60 = vsel %vm1084_vm8, %v1090_v55, %v1091_v56  ;;  %v1005_v5 = vsel %vm995_vm7, %v1002_v54, %v1004_v58  ;;  %v1180_v6 = vsel %vm721_vm0, %v1178_v62, %v1179_v61 }
 0x198   :  { %1040 = vrot.lane.b32.xlu1 %v1003_v59, %s2598_s17  ;;  %1129 = vrot.lane.b32.xlu0 %v1092_v60, %s2599_s22  ;;  %v1094_v11 = vsel %vm1084_vm8, %v1091_v56, %v1093_v0  ;;  %v1269_v12 = vsel %vm1261_vm9, %v1267_v8, %v1268_v7  ;;  %v1182_v15 = vsel %vm721_vm0, %v1179_v61, %v1181_v9 }
 0x199   :  { %v1271_v17 = vsel %vm1261_vm9, %v1268_v7, %v1270_v10 }
 0x19c   :  { %1042 = vrot.lane.b32.xlu1 %v1005_v5, %s2598_s17  ;;  %1217 = vrot.lane.b32.xlu0 %v1180_v6, %s2600_s27 }
 0x1a0   :  { %1131 = vrot.lane.b32.xlu1 %v1094_v11, %s2599_s22  ;;  %1306 = vrot.lane.b32.xlu0 %v1269_v12, %s2601_s0 }
 0x1a3   :  { %v2382_v13 = vpop.f32.mrb[6].mxu0 }
 0x1a4   :  { %v827_v14 = vadd.f32 %v2382_v13, %v2836_v45  ;;  %v821_v16 = vpop.f32.mrb[7].mxu0  ;;  %1219 = vrot.lane.b32.xlu1 %v1182_v15, %s2600_s27  ;;  %1308 = vrot.lane.b32.xlu0 %v1271_v17, %s2601_s0 }
 0x1a5   :  { %v822_v18 = vadd.f32 %v2836_v45, %v821_v16 }
 0x1a6   :  { %v2955_v19 = vmax.f32 %v827_v14, 0.0 }
 0x1a7   :  { %v916_v20 = vmax.f32 %v822_v18, 0.0 }
 0x1a8   :  { %v1007_v24 = vrot.slane %v2955_v19, 1  ;;  %v1096_v26 = vrot.slane %v2955_v19, 2  ;;  %v1184_v30 = vrot.slane %v2955_v19, 3  ;;  %v1273_v33 = vrot.slane %v2955_v19, 4 }
 0x1a9   :  { %v2959_v21 = vsel %vm938_vm6, %v916_v20, 0.0 }
 0x1aa   :  { %v1006_v22 = vrot.slane %v2959_v21, 1  ;;  %v1095_v25 = vrot.slane %v2959_v21, 2  ;;  %v1183_v29 = vrot.slane %v2959_v21, 3  ;;  %v1272_v32 = vrot.slane %v2959_v21, 4 }
 0x1ac   :  { %v1008_v27 = vsel %vm995_vm7, %v1006_v22, %v1007_v24  ;;  %v1097_v28 = vsel %vm1084_vm8, %v1095_v25, %v1096_v26  ;;  %v1185_v31 = vsel %vm721_vm0, %v1183_v29, %v1184_v30  ;;  %v1274_v34 = vsel %vm1261_vm9, %v1272_v32, %v1273_v33 }
 0x1ad   :  { %1044 = vrot.lane.b32.xlu1 %v1008_v27, %s2598_s17  ;;  %1133 = vrot.lane.b32.xlu0 %v1097_v28, %s2599_s22 }
 0x1b1   :  { %1221 = vrot.lane.b32.xlu0 %v1185_v31, %s2600_s27 }
 0x1b5   :  { %1310 = vrot.lane.b32.xlu0 %v1274_v34, %s2601_s0 }
 0x1b7   :  { %v2385_v35 = vpop.f32.mrb[8].mxu0 }
 0x1b8   :  { %v831_v36 = vpop.f32.mrb[9].mxu0  ;;  %v837_v47 = vadd.f32 %v2385_v35, %v2836_v45 }
 0x1b9   :  { %v832_v37 = vadd.f32 %v2836_v45, %v831_v36 }
 0x1ba   :  { %v919_v49 = vmax.f32 %v837_v47, 0.0 }
 0x1bb   :  { %v918_v38 = vmax.f32 %v832_v37, 0.0 }
 0x1bc   :  { %v2993_v58 = vsel %vm938_vm6, %v919_v49, 0.0 }
 0x1bd   :  { %v955_v39 = vsel %vm943_vm10, %v918_v38, 0.0  ;;  %v1100_v61 = vrot.slane %v2993_v58, 2  ;;  %v1011_v0 = vrot.slane %v2993_v58, 1  ;;  %v1188_v10 = vrot.slane %v2993_v58, 3 }
 0x1be   :  { %v1009_v40 = vrot.slane %v955_v39, 1  ;;  %v1275_v41 = vrot.slane %v955_v39, 4  ;;  %v1098_v42 = vrot.slane %v955_v39, 2  ;;  %v1186_v46 = vrot.slane %v955_v39, 3 }
 0x1bf   :  { %v1277_v15 = vrot.slane %v2993_v58, 4 }
 0x1c0   :  { %v1276_v43 = vsel %vm1261_vm9, %v1273_v33, %v1275_v41  ;;  %v1010_v44 = vsel %vm995_vm7, %v1007_v24, %v1009_v40  ;;  %v1099_v3 = vsel %vm1084_vm8, %v1096_v26, %v1098_v42  ;;  %v1187_v48 = vsel %vm721_vm0, %v1184_v30, %v1186_v46 }
 0x1c1   :  { %1312 = vrot.lane.b32.xlu0 %v1276_v43, %s2601_s0  ;;  %1046 = vrot.lane.b32.xlu1 %v1010_v44, %s2598_s17 }
 0x1c5   :  { %1135 = vrot.lane.b32.xlu1 %v1099_v3, %s2599_s22 }
 0x1c9   :  { %1223 = vrot.lane.b32.xlu1 %v1187_v48, %s2600_s27 }
 0x1cb   :  { %v2388_v52 = vpop.f32.mrb[10].mxu0 }
 0x1cc   :  { %v847_v53 = vadd.f32 %v2388_v52, %v2836_v45  ;;  %v841_v54 = vpop.f32.mrb[11].mxu0 }
 0x1cd   :  { %v842_v55 = vadd.f32 %v2836_v45, %v841_v54 }
 0x1ce   :  { %v921_v56 = vmax.f32 %v847_v53, 0.0 }
 0x1cf   :  { %v2995_v59 = vmax.f32 %v842_v55, 0.0 }
 0x1d0   :  { %v958_v60 = vsel %vm943_vm10, %v921_v56, 0.0 }
 0x1d1   :  { %v1101_v62 = vrot.slane %v2995_v59, 2  ;;  %v1012_v5 = vrot.slane %v2995_v59, 1  ;;  %v1014_v6 = vrot.slane %v958_v60, 1  ;;  %v1189_v9 = vrot.slane %v2995_v59, 3 }
 0x1d2   :  { %v1103_v11 = vrot.slane %v958_v60, 2  ;;  %v1278_v14 = vrot.slane %v2995_v59, 4  ;;  %v1191_v16 = vrot.slane %v958_v60, 3  ;;  %v1280_v17 = vrot.slane %v958_v60, 4 }
 0x1d3   :  { %v1102_v7 = vsel %vm1084_vm8, %v1100_v61, %v1101_v62  ;;  %v1013_v8 = vsel %vm995_vm7, %v1011_v0, %v1012_v5  ;;  %v1190_v12 = vsel %vm721_vm0, %v1188_v10, %v1189_v9  ;;  %v1015_v13 = vsel %vm995_vm7, %v1012_v5, %v1014_v6 }
 0x1d4   :  { %1137 = vrot.lane.b32.xlu0 %v1102_v7, %s2599_s22  ;;  %1048 = vrot.lane.b32.xlu1 %v1013_v8, %s2598_s17  ;;  %v1279_v18 = vsel %vm1261_vm9, %v1277_v15, %v1278_v14  ;;  %v1104_v20 = vsel %vm1084_vm8, %v1101_v62, %v1103_v11  ;;  %v1281_v26 = vsel %vm1261_vm9, %v1278_v14, %v1280_v17 }
 0x1d5   :  { %v1192_v27 = vsel %vm721_vm0, %v1189_v9, %v1191_v16 }
 0x1d8   :  { %1225 = vrot.lane.b32.xlu0 %v1190_v12, %s2600_s27  ;;  %1050 = vrot.lane.b32.xlu1 %v1015_v13, %s2598_s17 }
 0x1dc   :  { %1314 = vrot.lane.b32.xlu0 %v1279_v18, %s2601_s0  ;;  %1139 = vrot.lane.b32.xlu1 %v1104_v20, %s2599_s22 }
 0x1de   :  { %v2391_v22 = vpop.f32.mrb[12].mxu0 }
 0x1df   :  { %v857_v24 = vadd.f32 %v2391_v22, %v2836_v45  ;;  %v851_v25 = vpop.f32.mrb[13].mxu0 }
 0x1e0   :  { %v852_v28 = vadd.f32 %v2836_v45, %v851_v25  ;;  %1316 = vrot.lane.b32.xlu0 %v1281_v26, %s2601_s0  ;;  %1227 = vrot.lane.b32.xlu1 %v1192_v27, %s2600_s27 }
 0x1e1   :  { %v3023_v29 = vmax.f32 %v857_v24, 0.0 }
 0x1e2   :  { %v922_v30 = vmax.f32 %v852_v28, 0.0 }
 0x1e3   :  { %v1037_v31 = vpop.permute.xlu0 %1036  ;;  %v1106_v34 = vrot.slane %v3023_v29, 2  ;;  %v1017_v36 = vrot.slane %v3023_v29, 1  ;;  %v1194_v41 = vrot.slane %v3023_v29, 3  ;;  %v1283_v3 = vrot.slane %v3023_v29, 4 }
 0x1e4   :  { %v3029_v32 = vsel %vm938_vm6, %v922_v30, 0.0  ;;  %v1351_v46 = vsel %vm1350_vm11, %v2861_v63, %v1037_v31 }
 0x1e5   :  { %v1105_v33 = vrot.slane %v3029_v32, 2  ;;  %v1016_v35 = vrot.slane %v3029_v32, 1  ;;  %v1193_v40 = vrot.slane %v3029_v32, 3  ;;  %v1282_v44 = vrot.slane %v3029_v32, 4 }
 0x1e7   :  { %v1126_v37 = vpop.permute.xlu0 %1125  ;;  %v1107_v38 = vsel %vm1084_vm8, %v1105_v33, %v1106_v34  ;;  %v1018_v39 = vsel %vm995_vm7, %v1016_v35, %v1017_v36  ;;  %v1195_v43 = vsel %vm721_vm0, %v1193_v40, %v1194_v41  ;;  %v1284_v52 = vsel %vm1261_vm9, %v1282_v44, %v1283_v3 }
 0x1e8   :  { %1141 = vrot.lane.b32.xlu0 %v1107_v38, %s2599_s22  ;;  %1052 = vrot.lane.b32.xlu1 %v1018_v39, %s2598_s17  ;;  %v1368_v47 = vsel %vm1367_vm12, %v1351_v46, %v1126_v37 }
 0x1eb   :  { %v1214_v42 = vpop.permute.xlu0 %1213 }
 0x1ec   :  { %1229 = vrot.lane.b32.xlu0 %v1195_v43, %s2600_s27  ;;  %v1385_v48 = vsel %vm1384_vm13, %v1368_v47, %v1214_v42 }
 0x1ef   :  { %v1303_v49 = vpop.permute.xlu0 %1302 }
 0x1f0   :  { %1318 = vrot.lane.b32.xlu0 %v1284_v52, %s2601_s0  ;;  %v1402_v53 = vsel %vm1401_vm14, %v1385_v48, %v1303_v49 }
 0x1f1   :  { %2427 = vmatprep.mubr.msk.f32.mxu1 %vm1435_vm15, %v1402_v53 }
 0x1f2   :  { %v2394_v54 = vpop.f32.mrb[14].mxu0 }
 0x1f3   :  { %v861_v55 = vpop.f32.mrb[15].mxu0  ;;  %v867_v17 = vadd.f32 %v2394_v54, %v2836_v45 }
 0x1f4   :  { %v862_v63 = vadd.f32 %v2836_v45, %v861_v55 }
 0x1f6   :  { %v924_v56 = vmax.f32 %v862_v63, 0.0 }
 0x1f7   :  { %v1039_v60 = vpop.permute.xlu1 %1038  ;;  %v1305_v14 = vpop.permute.xlu0 %1304 }
 0x1f8   :  { %v961_v61 = vsel %vm943_vm10, %v924_v56, 0.0  ;;  %v1352_v9 = vsel %vm1350_vm11, %v2846_v57, %v1039_v60  ;;  %v925_v57 = vmax.f32 %v867_v17, 0.0 }
 0x1f9   :  { %v1019_v62 = vrot.slane %v961_v61, 1  ;;  %v1285_v0 = vrot.slane %v961_v61, 4  ;;  %v1108_v5 = vrot.slane %v961_v61, 2  ;;  %v1196_v10 = vrot.slane %v961_v61, 3 }
 0x1fa   :  { %v3075_v27 = vsel %vm938_vm6, %v925_v57, 0.0 }
 0x1fb   :  { %v1128_v6 = vpop.permute.xlu1 %1127  ;;  %v1286_v7 = vsel %vm1261_vm9, %v1283_v3, %v1285_v0  ;;  %v1020_v8 = vsel %vm995_vm7, %v1017_v36, %v1019_v62  ;;  %v1109_v13 = vsel %vm1084_vm8, %v1106_v34, %v1108_v5  ;;  %v1197_v18 = vsel %vm721_vm0, %v1194_v41, %v1196_v10 }
 0x1fc   :  { %1320 = vrot.lane.b32.xlu0 %v1286_v7, %s2601_s0  ;;  %1054 = vrot.lane.b32.xlu1 %v1020_v8, %s2598_s17  ;;  %v1369_v11 = vsel %vm1367_vm12, %v1352_v9, %v1128_v6  ;;  %v1110_v34 = vrot.slane %v3075_v27, 2  ;;  %v1021_v36 = vrot.slane %v3075_v27, 1  ;;  %v1198_v46 = vrot.slane %v3075_v27, 3 }
 0x1fd   :  { %v1287_v63 = vrot.slane %v3075_v27, 4 }
 0x1ff   :  { %v1216_v12 = vpop.permute.xlu1 %1215 }
 0x200   :  { %v1386_v15 = vsel %vm1384_vm13, %v1369_v11, %v1216_v12  ;;  %1143 = vrot.lane.b32.xlu1 %v1109_v13, %s2599_s22 }
 0x201   :  { %v1403_v16 = vsel %vm1401_vm14, %v1386_v15, %v1305_v14 }
 0x202   :  { %2428 = vmatmul.mubr.msk.f32.vlgmr.msra.gmra.mrb[0].mxu1 %vm1435_vm15, %v1403_v16 }
 0x204   :  { %1231 = vrot.lane.b32.xlu1 %v1197_v18, %s2600_s27 }
 0x206   :  { %v2397_v20 = vpop.f32.mrb[16].mxu0 }
 0x207   :  { %v877_v22 = vadd.f32 %v2397_v20, %v2836_v45  ;;  %v871_v24 = vpop.f32.mrb[17].mxu0 }
 0x208   :  { %v872_v25 = vadd.f32 %v2836_v45, %v871_v24 }
 0x209   :  { %v927_v26 = vmax.f32 %v877_v22, 0.0 }
 0x20a   :  { %v3077_v28 = vmax.f32 %v872_v25, 0.0  ;;  %v1041_v31 = vpop.permute.xlu1 %1040  ;;  %v1130_v33 = vpop.permute.xlu0 %1129 }
 0x20b   :  { %v964_v30 = vsel %vm943_vm10, %v927_v26, 0.0  ;;  %v1353_v39 = vsel %vm1350_vm11, %v2923_v50, %v1041_v31 }
 0x20c   :  { %v1111_v35 = vrot.slane %v3077_v28, 2  ;;  %v1022_v37 = vrot.slane %v3077_v28, 1  ;;  %v1024_v38 = vrot.slane %v964_v30, 1  ;;  %v1199_v44 = vrot.slane %v3077_v28, 3 }
 0x20d   :  { %v1113_v3 = vrot.slane %v964_v30, 2  ;;  %v1370_v47 = vsel %vm1367_vm12, %v1353_v39, %v1130_v33  ;;  %v1288_v54 = vrot.slane %v3077_v28, 4  ;;  %v1201_v56 = vrot.slane %v964_v30, 3 }
 0x20e   :  { %v1043_v40 = vpop.permute.xlu1 %1042  ;;  %v1218_v41 = vpop.permute.xlu0 %1217  ;;  %v1112_v42 = vsel %vm1084_vm8, %v1110_v34, %v1111_v35  ;;  %v1023_v43 = vsel %vm995_vm7, %v1021_v36, %v1022_v37  ;;  %v1200_v52 = vsel %vm721_vm0, %v1198_v46, %v1199_v44  ;;  %v1025_v53 = vsel %vm995_vm7, %v1022_v37, %v1024_v38 }
 0x20f   :  { %1145 = vrot.lane.b32.xlu0 %v1112_v42, %s2599_s22  ;;  %1056 = vrot.lane.b32.xlu1 %v1023_v43, %s2598_s17  ;;  %v1387_v48 = vsel %vm1384_vm13, %v1370_v47, %v1218_v41  ;;  %v1354_v60 = vsel %vm1350_vm11, %v2925_v51, %v1043_v40  ;;  %v1290_v61 = vrot.slane %v964_v30, 4  ;;  %v1289_v6 = vsel %vm1261_vm9, %v1287_v63, %v1288_v54 }
 0x210   :  { %v1114_v7 = vsel %vm1084_vm8, %v1111_v35, %v1113_v3  ;;  %v1202_v12 = vsel %vm721_vm0, %v1199_v44, %v1201_v56 }
 0x211   :  { %v1291_v11 = vsel %vm1261_vm9, %v1288_v54, %v1290_v61 }
 0x212   :  { %v1132_v50 = vpop.permute.xlu1 %1131  ;;  %v1307_v49 = vpop.permute.xlu0 %1306 }
 0x213   :  { %v1404_v55 = vsel %vm1401_vm14, %v1387_v48, %v1307_v49  ;;  %1233 = vrot.lane.b32.xlu0 %v1200_v52, %s2600_s27  ;;  %1058 = vrot.lane.b32.xlu1 %v1025_v53, %s2598_s17  ;;  %v1371_v62 = vsel %vm1367_vm12, %v1354_v60, %v1132_v50 }
 0x214   :  { %2430 = vmatprep.mubr.msk.f32.mxu1 %vm1435_vm15, %v1404_v55 }
 0x216   :  { %v1220_v0 = vpop.permute.xlu1 %1219  ;;  %v1309_v5 = vpop.permute.xlu0 %1308 }
 0x217   :  { %v1388_v8 = vsel %vm1384_vm13, %v1371_v62, %v1220_v0  ;;  %1322 = vrot.lane.b32.xlu0 %v1289_v6, %s2601_s0  ;;  %1147 = vrot.lane.b32.xlu1 %v1114_v7, %s2599_s22 }
 0x218   :  { %v1405_v9 = vsel %vm1401_vm14, %v1388_v8, %v1309_v5 }
 0x219   :  { %2431 = vmatmul.mubr.msk.f32.gmra.mrb[2].mxu1 %vm1435_vm15, %v1405_v9 }
 0x21a   :  { %v2400_v51 = vpop.f32.mrb[18].mxu0 }
 0x21b   :  { %v887_v10 = vadd.f32 %v2400_v51, %v2836_v45  ;;  %v881_v13 = vpop.f32.mrb[19].mxu0  ;;  %1324 = vrot.lane.b32.xlu0 %v1291_v11, %s2601_s0  ;;  %1235 = vrot.lane.b32.xlu1 %v1202_v12, %s2600_s27 }
 0x21c   :  { %v882_v14 = vadd.f32 %v2836_v45, %v881_v13 }
 0x21d   :  { %v3119_v15 = vmax.f32 %v887_v10, 0.0 }
 0x21e   :  { %v928_v16 = vmax.f32 %v882_v14, 0.0 }
 0x21f   :  { %v1134_v17 = vpop.permute.xlu0 %1133  ;;  %v1045_v57 = vpop.permute.xlu1 %1044  ;;  %v1116_v22 = vrot.slane %v3119_v15, 2  ;;  %v1027_v25 = vrot.slane %v3119_v15, 1  ;;  %v1204_v35 = vrot.slane %v3119_v15, 3  ;;  %v1293_v41 = vrot.slane %v3119_v15, 4 }
 0x220   :  { %v3123_v18 = vsel %vm938_vm6, %v928_v16, 0.0  ;;  %v1355_v26 = vsel %vm1350_vm11, %v2959_v21, %v1045_v57 }
 0x221   :  { %v1115_v20 = vrot.slane %v3123_v18, 2  ;;  %v1026_v24 = vrot.slane %v3123_v18, 1  ;;  %v1203_v34 = vrot.slane %v3123_v18, 3  ;;  %v1372_v36 = vsel %vm1367_vm12, %v1355_v26, %v1134_v17 }
 0x222   :  { %v1292_v39 = vrot.slane %v3123_v18, 4 }
 0x223   :  { %v1222_v30 = vpop.permute.xlu0 %1221  ;;  %v1117_v31 = vsel %vm1084_vm8, %v1115_v20, %v1116_v22  ;;  %v1028_v33 = vsel %vm995_vm7, %v1026_v24, %v1027_v25  ;;  %v1205_v21 = vsel %vm721_vm0, %v1203_v34, %v1204_v35 }
 0x224   :  { %1149 = vrot.lane.b32.xlu0 %v1117_v31, %s2599_s22  ;;  %1060 = vrot.lane.b32.xlu1 %v1028_v33, %s2598_s17  ;;  %v1389_v37 = vsel %vm1384_vm13, %v1372_v36, %v1222_v30  ;;  %v1294_v42 = vsel %vm1261_vm9, %v1292_v39, %v1293_v41 }
 0x227   :  { %v1311_v38 = vpop.permute.xlu0 %1310 }
 0x228   :  { %v1406_v40 = vsel %vm1401_vm14, %v1389_v37, %v1311_v38  ;;  %1237 = vrot.lane.b32.xlu0 %v1205_v21, %s2600_s27 }
 0x229   :  { %2433 = vmatprep.mubr.msk.f32.mxu1 %vm1435_vm15, %v1406_v40 }
 0x22c   :  { %1326 = vrot.lane.b32.xlu0 %v1294_v42, %s2601_s0 }
 0x22e   :  { %v2403_v43 = vpop.f32.mrb[20].mxu0 }
 0x22f   :  { %v891_v44 = vpop.f32.mrb[21].mxu0  ;;  %v897_v56 = vadd.f32 %v2403_v43, %v2836_v45 }
 0x230   :  { %v892_v46 = vadd.f32 %v2836_v45, %v891_v44 }
 0x231   :  { %v931_v8 = vmax.f32 %v897_v56, 0.0 }
 0x232   :  { %v930_v3 = vmax.f32 %v892_v46, 0.0 }
 0x233   :  { %v1047_v47 = vpop.permute.xlu1 %1046  ;;  %v1313_v5 = vpop.permute.xlu0 %1312  ;;  %v3169_v13 = vsel %vm938_vm6, %v931_v8, 0.0  ;;  %vm1672_vm6 = vcmask 1047559  }
 0x234   :  { %v967_v48 = vsel %vm943_vm10, %v930_v3, 0.0  ;;  %v1356_v63 = vsel %vm1350_vm11, %v2955_v19, %v1047_v47  ;;  %v1120_v17 = vrot.slane %v3169_v13, 2  ;;  %v1031_v20 = vrot.slane %v3169_v13, 1 }
 0x235   :  { %v1029_v50 = vrot.slane %v967_v48, 1  ;;  %v1295_v49 = vrot.slane %v967_v48, 4  ;;  %v1118_v52 = vrot.slane %v967_v48, 2  ;;  %v1206_v60 = vrot.slane %v967_v48, 3 }
 0x236   :  { %v1208_v23 = vrot.slane %v3169_v13, 3  ;;  %v1297_v40 = vrot.slane %v3169_v13, 4 }
 0x237   :  { %v1136_v53 = vpop.permute.xlu1 %1135  ;;  %v1296_v54 = vsel %vm1261_vm9, %v1293_v41, %v1295_v49  ;;  %v1030_v55 = vsel %vm995_vm7, %v1027_v25, %v1029_v50  ;;  %v1119_v0 = vsel %vm1084_vm8, %v1116_v22, %v1118_v52  ;;  %v1207_v19 = vsel %vm721_vm0, %v1204_v35, %v1206_v60 }
 0x238   :  { %1328 = vrot.lane.b32.xlu0 %v1296_v54, %s2601_s0  ;;  %1062 = vrot.lane.b32.xlu1 %v1030_v55, %s2598_s17  ;;  %v1373_v61 = vsel %vm1367_vm12, %v1356_v63, %v1136_v53 }
 0x23b   :  { %v1224_v62 = vpop.permute.xlu1 %1223 }
 0x23c   :  { %v1390_v6 = vsel %vm1384_vm13, %v1373_v61, %v1224_v62  ;;  %1151 = vrot.lane.b32.xlu1 %v1119_v0, %s2599_s22 }
 0x23d   :  { %v1407_v7 = vsel %vm1401_vm14, %v1390_v6, %v1313_v5 }
 0x23e   :  { %2434 = vmatmul.mubr.msk.f32.gmra.mrb[4].mxu1 %vm1435_vm15, %v1407_v7 }
 0x23f   :  { %v2406_v9 = vpop.f32.mrb[22].mxu0 }
 0x240   :  { %v907_v51 = vadd.f32 %v2406_v9, %v2836_v45  ;;  %1239 = vrot.lane.b32.xlu1 %v1207_v19, %s2600_s27  ;;  %v901_v10 = vpop.f32.mrb[23].mxu0 }
 0x241   :  { %v902_v11 = vadd.f32 %v2836_v45, %v901_v10 }
 0x242   :  { %v933_v12 = vmax.f32 %v907_v51, 0.0 }
 0x243   :  { %v3171_v14 = vmax.f32 %v902_v11, 0.0 }
 0x244   :  { %v970_v16 = vsel %vm943_vm10, %v933_v12, 0.0 }
 0x245   :  { %v1121_v57 = vrot.slane %v3171_v14, 2  ;;  %v1032_v22 = vrot.slane %v3171_v14, 1  ;;  %v1034_v25 = vrot.slane %v970_v16, 1  ;;  %v1209_v31 = vrot.slane %v3171_v14, 3 }
 0x246   :  { %v1049_v24 = vpop.permute.xlu1 %1048  ;;  %v1138_v45 = vpop.permute.xlu0 %1137  ;;  %v1298_v38 = vrot.slane %v3171_v14, 4  ;;  %v1123_v21 = vrot.slane %v970_v16, 2  ;;  %v1211_v46 = vrot.slane %v970_v16, 3  ;;  %v1300_v53 = vrot.slane %v970_v16, 4 }
 0x247   :  { %v1122_v26 = vsel %vm1084_vm8, %v1120_v17, %v1121_v57  ;;  %v1033_v30 = vsel %vm995_vm7, %v1031_v20, %v1032_v22  ;;  %v1357_v33 = vsel %vm1350_vm11, %v2993_v58, %v1049_v24  ;;  %v1210_v36 = vsel %vm721_vm0, %v1208_v23, %v1209_v31 }
 0x248   :  { %1153 = vrot.lane.b32.xlu0 %v1122_v26, %s2599_s22  ;;  %1064 = vrot.lane.b32.xlu1 %v1033_v30, %s2598_s17  ;;  %v1035_v37 = vsel %vm995_vm7, %v1032_v22, %v1034_v25  ;;  %v1374_v39 = vsel %vm1367_vm12, %v1357_v33, %v1138_v45  ;;  %v1299_v44 = vsel %vm1261_vm9, %v1297_v40, %v1298_v38  ;;  %vm1934_vm7 = vcmask 785408  }
 0x249   :  { %v1124_v3 = vsel %vm1084_vm8, %v1121_v57, %v1123_v21  ;;  %v1212_v55 = vsel %vm721_vm0, %v1209_v31, %v1211_v46  ;;  %v1301_v63 = vsel %vm1261_vm9, %v1298_v38, %v1300_v53  ;;  %vm1654_vm0 = vcmask 1041409  }
 0x24a   :  { %v1051_v34 = vpop.permute.xlu1 %1050  ;;  %v1226_v35 = vpop.permute.xlu0 %1225  ;;  %vm2187_vm8 = vcmask 57344  }
 0x24b   :  { %v1391_v41 = vsel %vm1384_vm13, %v1374_v39, %v1226_v35  ;;  %v1358_v47 = vsel %vm1350_vm11, %v2995_v59, %v1051_v34 }
 0x24c   :  { %1241 = vrot.lane.b32.xlu0 %v1210_v36, %s2600_s27  ;;  %1066 = vrot.lane.b32.xlu1 %v1035_v37, %s2598_s17 }
 0x24e   :  { %v1140_v58 = vpop.permute.xlu1 %1139  ;;  %v1315_v42 = vpop.permute.xlu0 %1314 }
 0x24f   :  { %v1408_v43 = vsel %vm1401_vm14, %v1391_v41, %v1315_v42  ;;  %v1375_v48 = vsel %vm1367_vm12, %v1358_v47, %v1140_v58 }
 0x250   :  { %2436 = vmatprep.mubr.msk.f32.mxu1 %vm1435_vm15, %v1408_v43  ;;  %1330 = vrot.lane.b32.xlu0 %v1299_v44, %s2601_s0 }
 0x251   :  { %1155 = vrot.lane.b32.xlu1 %v1124_v3, %s2599_s22 }
 0x252   :  { %v1228_v50 = vpop.permute.xlu1 %1227  ;;  %v1317_v49 = vpop.permute.xlu0 %1316 }
 0x253   :  { %v1392_v52 = vsel %vm1384_vm13, %v1375_v48, %v1228_v50 }
 0x254   :  { %v1409_v54 = vsel %vm1401_vm14, %v1392_v52, %v1317_v49 }
 0x255   :  { %1243 = vrot.lane.b32.xlu1 %v1212_v55, %s2600_s27  ;;  %2437 = vmatmul.mubr.msk.f32.gmra.mrb[6].mxu1 %vm1435_vm15, %v1409_v54 }
 0x259   :  { %1332 = vrot.lane.b32.xlu1 %v1301_v63, %s2601_s0 }
 0x25a   :  { %v1142_v59 = vpop.permute.xlu0 %1141  ;;  %v1053_v56 = vpop.permute.xlu1 %1052 }
 0x25b   :  { %v1359_v60 = vsel %vm1350_vm11, %v3029_v32, %v1053_v56 }
 0x25c   :  { %v1376_v62 = vsel %vm1367_vm12, %v1359_v60, %v1142_v59 }
 0x25e   :  { %v1230_v61 = vpop.permute.xlu0 %1229 }
 0x25f   :  { %v1393_v0 = vsel %vm1384_vm13, %v1376_v62, %v1230_v61 }
 0x262   :  { %v1319_v5 = vpop.permute.xlu0 %1318 }
 0x263   :  { %v1410_v6 = vsel %vm1401_vm14, %v1393_v0, %v1319_v5  ;;  %v3262_v5 = vld [vmem:[%s3706_s4] ss:$0 sm:$0xff] }
 0x264   :  { %2439 = vmatprep.mubr.msk.f32.mxu1 %vm1435_vm15, %v1410_v6 }
 0x26e   :  { %v1055_v7 = vpop.permute.xlu1 %1054  ;;  %v1321_v10 = vpop.permute.xlu0 %1320 }
 0x26f   :  { %v1360_v9 = vsel %vm1350_vm11, %v3023_v29, %v1055_v7 }
 0x272   :  { %v1144_v8 = vpop.permute.xlu1 %1143 }
 0x273   :  { %v1377_v19 = vsel %vm1367_vm12, %v1360_v9, %v1144_v8 }
 0x276   :  { %v1232_v51 = vpop.permute.xlu1 %1231 }
 0x277   :  { %v1394_v32 = vsel %vm1384_vm13, %v1377_v19, %v1232_v51 }
 0x278   :  { %v1411_v11 = vsel %vm1401_vm14, %v1394_v32, %v1321_v10 }
 0x279   :  { %2440 = vmatmul.mubr.msk.f32.gmra.mrb[8].mxu1 %vm1435_vm15, %v1411_v11 }
 0x281   :  { %v1057_v12 = vpop.permute.xlu1 %1056  ;;  %v1146_v16 = vpop.permute.xlu0 %1145 }
 0x282   :  { %v1361_v17 = vsel %vm1350_vm11, %v3075_v27, %v1057_v12 }
 0x283   :  { %v1378_v22 = vsel %vm1367_vm12, %v1361_v17, %v1146_v16 }
 0x285   :  { %v1059_v57 = vpop.permute.xlu1 %1058  ;;  %v1234_v20 = vpop.permute.xlu0 %1233 }
 0x286   :  { %v1395_v29 = vsel %vm1384_vm13, %v1378_v22, %v1234_v20  ;;  %v1362_v26 = vsel %vm1350_vm11, %v3077_v28, %v1059_v57 }
 0x289   :  { %v1148_v24 = vpop.permute.xlu1 %1147  ;;  %v1323_v45 = vpop.permute.xlu0 %1322 }
 0x28a   :  { %v1412_v25 = vsel %vm1401_vm14, %v1395_v29, %v1323_v45  ;;  %v1379_v30 = vsel %vm1367_vm12, %v1362_v26, %v1148_v24 }
 0x28b   :  { %2442 = vmatprep.mubr.msk.f32.mxu1 %vm1435_vm15, %v1412_v25 }
 0x28d   :  { %v1236_v31 = vpop.permute.xlu1 %1235  ;;  %v1325_v23 = vpop.permute.xlu0 %1324 }
 0x28e   :  { %v1396_v27 = vsel %vm1384_vm13, %v1379_v30, %v1236_v31 }
 0x28f   :  { %v1413_v33 = vsel %vm1401_vm14, %v1396_v27, %v1325_v23 }
 0x290   :  { %2443 = vmatmul.mubr.msk.f32.gmra.mrb[10].mxu1 %vm1435_vm15, %v1413_v33 }
 0x296   :  { %v1150_v34 = vpop.permute.xlu0 %1149  ;;  %v1061_v35 = vpop.permute.xlu1 %1060 }
 0x297   :  { %v1363_v36 = vsel %vm1350_vm11, %v3123_v18, %v1061_v35 }
 0x298   :  { %v1380_v38 = vsel %vm1367_vm12, %v1363_v36, %v1150_v34 }
 0x29a   :  { %v1238_v37 = vpop.permute.xlu0 %1237 }
 0x29b   :  { %v1397_v28 = vsel %vm1384_vm13, %v1380_v38, %v1238_v37 }
 0x29e   :  { %v1327_v21 = vpop.permute.xlu0 %1326 }
 0x29f   :  { %v1414_v39 = vsel %vm1401_vm14, %v1397_v28, %v1327_v21 }
 0x2a0   :  { %2445 = vmatprep.mubr.msk.f32.mxu1 %vm1435_vm15, %v1414_v39 }
 0x2aa   :  { %v1063_v40 = vpop.permute.xlu1 %1062  ;;  %v1329_v44 = vpop.permute.xlu0 %1328 }
 0x2ab   :  { %v1364_v58 = vsel %vm1350_vm11, %v3119_v15, %v1063_v40 }
 0x2ae   :  { %v1152_v41 = vpop.permute.xlu1 %1151 }
 0x2af   :  { %v1381_v42 = vsel %vm1367_vm12, %v1364_v58, %v1152_v41 }
 0x2b2   :  { %v1240_v43 = vpop.permute.xlu1 %1239 }
 0x2b3   :  { %v1398_v18 = vsel %vm1384_vm13, %v1381_v42, %v1240_v43 }
 0x2b4   :  { %v1415_v46 = vsel %vm1401_vm14, %v1398_v18, %v1329_v44 }
 0x2b5   :  { %2446 = vmatmul.mubr.msk.f32.gmra.mrb[12].mxu1 %vm1435_vm15, %v1415_v46 }
 0x2ba   :  { %v1065_v3 = vpop.permute.xlu1 %1064  ;;  %v1154_v47 = vpop.permute.xlu0 %1153 }
 0x2bb   :  { %v1365_v48 = vsel %vm1350_vm11, %v3169_v13, %v1065_v3 }
 0x2bc   :  { %v1382_v52 = vsel %vm1367_vm12, %v1365_v48, %v1154_v47 }
 0x2be   :  { %v1067_v50 = vpop.permute.xlu1 %1066  ;;  %v1242_v49 = vpop.permute.xlu0 %1241 }
 0x2bf   :  { %v1399_v15 = vsel %vm1384_vm13, %v1382_v52, %v1242_v49  ;;  %v1366_v59 = vsel %vm1350_vm11, %v3171_v14, %v1067_v50 }
 0x2c2   :  { %v1331_v53 = vpop.permute.xlu0 %1330 }
 0x2c3   :  { %v1156_v54 = vpop.permute.xlu1 %1155  ;;  %v1416_v55 = vsel %vm1401_vm14, %v1399_v15, %v1331_v53 }
 0x2c4   :  { %2448 = vmatprep.mubr.msk.f32.mxu1 %vm1435_vm15, %v1416_v55  ;;  %v1383_v56 = vsel %vm1367_vm12, %v1366_v59, %v1156_v54 }
 0x2c7   :  { %v1244_v63 = vpop.permute.xlu1 %1243 }
 0x2c8   :  { %v1400_v13 = vsel %vm1384_vm13, %v1383_v56, %v1244_v63 }
 0x2cb   :  { %v1333_v60 = vpop.permute.xlu1 %1332 }
 0x2cc   :  { %v1417_v61 = vsel %vm1401_vm14, %v1400_v13, %v1333_v60 }
 0x2cd   :  { %2449 = vmatmul.mubr.msk.f32.gmra.mrb[14].mxu1 %vm1435_vm15, %v1417_v61 }
 0x2d5   :  { %v2429_v62 = vpop.f32.mrb[0].mxu1 }
 0x2d6   :  { %v1550_v0 = vpop.f32.mrb[1].mxu1  ;;  %v1556_v6 = vadd.f32 %v2429_v62, %v3262_v5 }
 0x2d7   :  { %v1551_v14 = vadd.f32 %v3262_v5, %v1550_v0 }
 0x2d8   :  { %v1630_v7 = vmax.f32 %v1556_v6, 0.0 }
 0x2d9   :  { %v1629_v8 = vmax.f32 %v1551_v14, 0.0 }
 0x2da   :  { %v1815_v19 = vrot.slane %v1630_v7, 1  ;;  %v1881_v51 = vrot.slane %v1630_v7, 5  ;;  %v1849_v12 = vrot.slane %v1630_v7, 3  ;;  %v1915_v16 = vrot.slane %v1630_v7, 7 }
 0x2db   :  { %v1675_v11 = vrot.slane %v1629_v8, 1  ;;  %v1741_v57 = vrot.slane %v1629_v8, 5  ;;  %v1692_v20 = vrot.slane %v1629_v8, 2  ;;  %v1758_v22 = vrot.slane %v1629_v8, 6 }
 0x2dc   :  { %v1709_v24 = vrot.slane %v1629_v8, 3  ;;  %v1775_v45 = vrot.slane %v1629_v8, 7  ;;  %v1832_v25 = vrot.slane %v1630_v7, 2  ;;  %v1898_v30 = vrot.slane %v1630_v7, 6 }
 0x2dd   :  { %v1726_v31 = vrot.slane %v1629_v8, 4  ;;  %v1866_v23 = vrot.slane %v1630_v7, 4 }
 0x2ec   :  { %v2432_v9 = vpop.f32.mrb[2].mxu1 }
 0x2ed   :  { %v1566_v10 = vadd.f32 %v2432_v9, %v3262_v5  ;;  %v1560_v32 = vpop.f32.mrb[3].mxu1 }
 0x2ee   :  { %v1561_v17 = vadd.f32 %v3262_v5, %v1560_v32 }
 0x2ef   :  { %v1632_v29 = vmax.f32 %v1566_v10, 0.0 }
 0x2f0   :  { %v1631_v26 = vmax.f32 %v1561_v17, 0.0 }
 0x2f1   :  { %v1816_v27 = vsel %vm1654_vm0, %v1632_v29, %v1815_v19  ;;  %v1882_v33 = vrot.slane %v1632_v29, 4  ;;  %v1850_v34 = vrot.slane %v1632_v29, 2  ;;  %v1916_v35 = vrot.slane %v1632_v29, 6 }
 0x2f2   :  { %v1676_v36 = vsel %vm1654_vm0, %v1631_v26, %v1675_v11  ;;  %v1742_v37 = vrot.slane %v1631_v26, 4  ;;  %v1693_v38 = vrot.slane %v1631_v26, 1  ;;  %v1759_v28 = vrot.slane %v1631_v26, 5 }
 0x2f3   :  { %v1883_v21 = vsel %vm1654_vm0, %v1882_v33, %v1881_v51  ;;  %v1710_v39 = vrot.slane %v1631_v26, 2  ;;  %v1776_v40 = vrot.slane %v1631_v26, 6  ;;  %v1851_v41 = vsel %vm1654_vm0, %v1850_v34, %v1849_v12 }
 0x2f4   :  { %v1743_v58 = vsel %vm1654_vm0, %v1742_v37, %v1741_v57  ;;  %v1694_v42 = vsel %vm1654_vm0, %v1693_v38, %v1692_v20  ;;  %v1760_v43 = vsel %vm1654_vm0, %v1759_v28, %v1758_v22  ;;  %v1917_v44 = vsel %vm1654_vm0, %v1916_v35, %v1915_v16 }
 0x2f5   :  { %v1711_v18 = vsel %vm1654_vm0, %v1710_v39, %v1709_v24  ;;  %v1777_v46 = vsel %vm1654_vm0, %v1776_v40, %v1775_v45  ;;  %v1833_v3 = vrot.slane %v1632_v29, 1  ;;  %v1899_v47 = vrot.slane %v1632_v29, 5 }
 0x2f6   :  { %v1800_v48 = vrot.slane %v1632_v29, 7  ;;  %v1653_v50 = vrot.slane %v1631_v26, 7  ;;  %v1727_v49 = vrot.slane %v1631_v26, 3  ;;  %v1867_v52 = vrot.slane %v1632_v29, 3 }
 0x2f7   :  { %v1834_v15 = vsel %vm1654_vm0, %v1833_v3, %v1832_v25  ;;  %v1900_v53 = vsel %vm1654_vm0, %v1899_v47, %v1898_v30 }
 0x2f8   :  { %v1801_v54 = vsel %vm1654_vm0, %v1800_v48, %v1630_v7  ;;  %v1655_v55 = vsel %vm1654_vm0, %v1653_v50, %v1629_v8  ;;  %v1728_v63 = vsel %vm1654_vm0, %v1727_v49, %v1726_v31  ;;  %v1868_v59 = vsel %vm1654_vm0, %v1867_v52, %v1866_v23 }
 0x311   :  { %v2435_v56 = vpop.f32.mrb[4].mxu1 }
 0x312   :  { %v1576_v13 = vadd.f32 %v2435_v56, %v3262_v5  ;;  %v1570_v60 = vpop.f32.mrb[5].mxu1 }
 0x313   :  { %v1571_v61 = vadd.f32 %v3262_v5, %v1570_v60 }
 0x314   :  { %v1634_v62 = vmax.f32 %v1576_v13, 0.0 }
 0x315   :  { %v1633_v0 = vmax.f32 %v1571_v61, 0.0 }
 0x316   :  { %v1817_v6 = vrot.slane %v1634_v62, 7  ;;  %v1884_v14 = vrot.slane %v1634_v62, 3  ;;  %v1852_v9 = vrot.slane %v1634_v62, 1  ;;  %v1918_v19 = vrot.slane %v1634_v62, 5 }
 0x317   :  { %v1677_v7 = vrot.slane %v1633_v0, 7  ;;  %v1744_v51 = vrot.slane %v1633_v0, 3  ;;  %v1695_v8 = vsel %vm1657_vm1, %v1633_v0, %v1694_v42  ;;  %v1761_v10 = vrot.slane %v1633_v0, 4 }
 0x318   :  { %v1818_v32 = vsel %vm1657_vm1, %v1817_v6, %v1816_v27  ;;  %v1885_v11 = vsel %vm1657_vm1, %v1884_v14, %v1883_v21  ;;  %v1712_v12 = vrot.slane %v1633_v0, 1  ;;  %v1778_v16 = vrot.slane %v1633_v0, 5 }
 0x319   :  { %v1678_v17 = vsel %vm1657_vm1, %v1677_v7, %v1676_v36  ;;  %v1745_v57 = vsel %vm1657_vm1, %v1744_v51, %v1743_v58  ;;  %v1762_v20 = vsel %vm1657_vm1, %v1761_v10, %v1760_v43  ;;  %v1853_v22 = vsel %vm1657_vm1, %v1852_v9, %v1851_v41  ;;  %v1961_v9 = vld [vmem:[%s3707_s5 + $0x80] sm:$0xff]  ;;  %v1963_v10 = vld [vmem:[%s3707_s5 + $0x90] sm:$0xff] }
 0x31a   :  { %v1713_v29 = vsel %vm1657_vm1, %v1712_v12, %v1711_v18  ;;  %v1779_v24 = vsel %vm1657_vm1, %v1778_v16, %v1777_v46  ;;  %v1919_v45 = vsel %vm1657_vm1, %v1918_v19, %v1917_v44  ;;  %v1835_v25 = vsel %vm1657_vm1, %v1634_v62, %v1834_v15  ;;  %v1962_v19 = vld [vmem:[%s3707_s5 + $0x88] sm:$0xff]  ;;  %v1945_v7 = vld [vmem:[%s3707_s5] sm:$0xff] }
 0x31b   :  { %v1901_v26 = vrot.slane %v1634_v62, 4  ;;  %v1802_v30 = vrot.slane %v1634_v62, 6  ;;  %v1656_v31 = vrot.slane %v1633_v0, 6  ;;  %v1729_v23 = vrot.slane %v1633_v0, 2 }
 0x31c   :  { %v1869_v27 = vrot.slane %v1634_v62, 2  ;;  %v2471_v51 = vpack.c.bf16 %v1962_v19, %v1961_v9 }
 0x31d   :  { %v1902_v33 = vsel %vm1657_vm1, %v1901_v26, %v1900_v53  ;;  %v1803_v34 = vsel %vm1657_vm1, %v1802_v30, %v1801_v54  ;;  %v1658_v35 = vsel %vm1657_vm1, %v1656_v31, %v1655_v55  ;;  %v1730_v36 = vsel %vm1657_vm1, %v1729_v23, %v1728_v63  ;;  %v1949_v26 = vld [vmem:[%s3707_s5 + $0x20] sm:$0xff]  ;;  %v1950_v30 = vld [vmem:[%s3707_s5 + $0x28] sm:$0xff] }
 0x31e   :  { %v1870_v37 = vsel %vm1657_vm1, %v1869_v27, %v1868_v59  ;;  %2472 = vmatprep.subr.bf16.mxu0 %v2471_v51  ;;  %v1993_v31 = vld [vmem:[%s3707_s5 + $0x180] sm:$0xff]  ;;  %v1967_v27 = vld [vmem:[%s3707_s5 + $0xb0] sm:$0xff]  ;;  %v1954_v51 = vld [vmem:[%s3707_s5 + $0x48] sm:$0xff] }
 0x328   :  { %v2438_v38 = vpop.f32.mrb[6].mxu1 }
 0x329   :  { %v1586_v28 = vadd.f32 %v2438_v38, %v3262_v5  ;;  %v1580_v21 = vpop.f32.mrb[7].mxu1  ;;  %v1995_v38 = vld [vmem:[%s3707_s5 + $0x190] sm:$0xff] }
 0x32a   :  { %v1581_v39 = vadd.f32 %v3262_v5, %v1580_v21  ;;  %v1996_v21 = vld [vmem:[%s3707_s5 + $0x198] sm:$0xff] }
 0x32b   :  { %v1636_v40 = vmax.f32 %v1586_v28, 0.0 }
 0x32c   :  { %v1635_v41 = vmax.f32 %v1581_v39, 0.0  ;;  %v1979_v39 = vld [vmem:[%s3707_s5 + $0x110] sm:$0xff] }
 0x32d   :  { %v1819_v58 = vrot.slane %v1636_v40, 6  ;;  %v1886_v42 = vrot.slane %v1636_v40, 2  ;;  %v3305_v43 = vsel %vm1660_vm2, %v1636_v40, %v1853_v22  ;;  %v1920_v44 = vrot.slane %v1636_v40, 4  ;;  %v1948_v22 = vld [vmem:[%s3707_s5 + $0x18] sm:$0xff] }
 0x32e   :  { %v1679_v18 = vrot.slane %v1635_v41, 6  ;;  %v1746_v46 = vrot.slane %v1635_v41, 2  ;;  %v1696_v3 = vrot.slane %v1635_v41, 7  ;;  %v1763_v47 = vrot.slane %v1635_v41, 3 }
 0x32f   :  { %v3308_v48 = vsel %vm1660_vm2, %v1819_v58, %v1818_v32  ;;  %v3311_v50 = vsel %vm1660_vm2, %v1886_v42, %v1885_v11  ;;  %v3314_v49 = vsel %vm1660_vm2, %v1635_v41, %v1713_v29  ;;  %v1780_v52 = vrot.slane %v1635_v41, 4  ;;  %v1964_v32 = vld [vmem:[%s3707_s5 + $0x98] sm:$0xff]  ;;  %v1965_v29 = vld [vmem:[%s3707_s5 + $0xa0] sm:$0xff]  ;;  %v1951_v58 = vld [vmem:[%s3707_s5 + $0x30] sm:$0xff] }
 0x330   :  { %v3317_v15 = vsel %vm1660_vm2, %v1679_v18, %v1678_v17  ;;  %v3320_v53 = vsel %vm1660_vm2, %v1746_v46, %v1745_v57  ;;  %v3323_v54 = vsel %vm1660_vm2, %v1696_v3, %v1695_v8  ;;  %v3326_v55 = vsel %vm1660_vm2, %v1763_v47, %v1762_v20  ;;  %v1946_v8 = vld [vmem:[%s3707_s5 + $0x8] sm:$0xff]  ;;  %v1947_v20 = vld [vmem:[%s3707_s5 + $0x10] sm:$0xff]  ;;  %v1952_v42 = vld [vmem:[%s3707_s5 + $0x38] sm:$0xff] }
 0x331   :  { %v3329_v63 = vsel %vm1660_vm2, %v1780_v52, %v1779_v24  ;;  %v3332_v59 = vsel %vm1660_vm2, %v1920_v44, %v1919_v45  ;;  %v1836_v56 = vrot.slane %v1636_v40, 7  ;;  %v1903_v13 = vrot.slane %v1636_v40, 3  ;;  %v1966_v45 = vld [vmem:[%s3707_s5 + $0xa8] sm:$0xff]  ;;  %v1969_v3 = vld [vmem:[%s3707_s5 + $0xc0] sm:$0xff] }
 0x332   :  { %v1804_v60 = vrot.slane %v1636_v40, 5  ;;  %v1659_v61 = vrot.slane %v1635_v41, 5  ;;  %v1731_v62 = vrot.slane %v1635_v41, 1  ;;  %v1871_v0 = vrot.slane %v1636_v40, 1  ;;  %v1980_v40 = vld [vmem:[%s3707_s5 + $0x118] sm:$0xff]  ;;  %v1997_v47 = vld [vmem:[%s3707_s5 + $0x1a0] sm:$0xff] }
 0x333   :  { %v3335_v6 = vsel %vm1660_vm2, %v1836_v56, %v1835_v25  ;;  %v3338_v14 = vsel %vm1660_vm2, %v1903_v13, %v1902_v33  ;;  %v2473_v17 = vpack.c.bf16 %v1946_v8, %v1945_v7  ;;  %v2475_v57 = vpack.c.bf16 %v1964_v32, %v1963_v10  ;;  %v1968_v33 = vld [vmem:[%s3707_s5 + $0xb8] sm:$0xff]  ;;  %v1998_v52 = vld [vmem:[%s3707_s5 + $0x1a8] sm:$0xff]  ;;  %v1953_v7 = vld [vmem:[%s3707_s5 + $0x40] sm:$0xff] }
 0x334   :  { %v3359_v11 = vsel %vm1660_vm2, %v1804_v60, %v1803_v34  ;;  %v3362_v12 = vsel %vm1660_vm2, %v1659_v61, %v1658_v35  ;;  %v3365_v16 = vsel %vm1660_vm2, %v1731_v62, %v1730_v36  ;;  %v3377_v24 = vsel %vm1660_vm2, %v1871_v0, %v1870_v37  ;;  %v1994_v34 = vld [vmem:[%s3707_s5 + $0x188] sm:$0xff]  ;;  %v1977_v36 = vld [vmem:[%s3707_s5 + $0x100] sm:$0xff]  ;;  %v1999_v62 = vld [vmem:[%s3707_s5 + $0x1b0] sm:$0xff] }
 0x335   :  { %2474 = vmatpush3.bf16.msra.mxu0 %v2473_v17  ;;  %v2477_v25 = vpack.c.bf16 %v1948_v22, %v1947_v20  ;;  %v2479_v23 = vpack.c.bf16 %v1966_v45, %v1965_v29  ;;  %v2503_v35 = vpack.c.bf16 %v1994_v34, %v1993_v31  ;;  %v1978_v37 = vld [vmem:[%s3707_s5 + $0x108] sm:$0xff]  ;;  %v2481_v41 = vpack.c.bf16 %v1950_v30, %v1949_v26  ;;  %v1981_v60 = vld [vmem:[%s3707_s5 + $0x120] sm:$0xff]  ;;  %v2000_v0 = vld [vmem:[%s3707_s5 + $0x1b8] sm:$0xff] }
 0x336   :  { %2476 = vmatprep.subr.bf16.mxu0 %v2475_v57  ;;  %v2505_v28 = vpack.c.bf16 %v1978_v37, %v1977_v36  ;;  %v2507_v44 = vpack.c.bf16 %v1996_v21, %v1995_v38  ;;  %v2483_v18 = vpack.c.bf16 %v1968_v33, %v1967_v27  ;;  %v2509_v46 = vpack.c.bf16 %v1980_v40, %v1979_v39  ;;  %v1970_v56 = vld [vmem:[%s3707_s5 + $0xc8] sm:$0xff]  ;;  %v1971_v10 = vld [vmem:[%s3707_s5 + $0xd0] sm:$0xff]  ;;  %v1972_v32 = vld [vmem:[%s3707_s5 + $0xd8] sm:$0xff] }
 0x337   :  { %2504 = vmatprep.subr.bf16.mxu1 %v2503_v35  ;;  %v2511_v13 = vpack.c.bf16 %v1998_v52, %v1997_v47  ;;  %v1982_v61 = vld [vmem:[%s3707_s5 + $0x128] sm:$0xff]  ;;  %v2485_v9 = vpack.c.bf16 %v1952_v42, %v1951_v58  ;;  %v2487_v19 = vpack.c.bf16 %v1970_v56, %v1969_v3  ;;  %v2515_v17 = vpack.c.bf16 %v2000_v0, %v1999_v62  ;;  %v1983_v57 = vld [vmem:[%s3707_s5 + $0x130] sm:$0xff]  ;;  %v1984_v20 = vld [vmem:[%s3707_s5 + $0x138] sm:$0xff] }
 0x338   :  { %2506 = vmatpush3.bf16.msra.mxu1 %v2505_v28  ;;  %v2513_v8 = vpack.c.bf16 %v1982_v61, %v1981_v60  ;;  %v2001_v22 = vld [vmem:[%s3707_s5 + $0x1c0] sm:$0xff]  ;;  %v2002_v29 = vld [vmem:[%s3707_s5 + $0x1c8] sm:$0xff]  ;;  %v2489_v45 = vpack.c.bf16 %v1954_v51, %v1953_v7  ;;  %v1955_v26 = vld [vmem:[%s3707_s5 + $0x50] sm:$0xff]  ;;  %v2517_v31 = vpack.c.bf16 %v1984_v20, %v1983_v57 }
 0x339   :  { %2478 = vmatpush3.bf16.msra.mxu0 %v2477_v25  ;;  %2508 = vmatprep.subr.bf16.mxu1 %v2507_v44  ;;  %v2491_v25 = vpack.c.bf16 %v1972_v32, %v1971_v10  ;;  %v1956_v30 = vld [vmem:[%s3707_s5 + $0x58] sm:$0xff]  ;;  %v2519_v27 = vpack.c.bf16 %v2002_v29, %v2001_v22  ;;  %v1986_v33 = vld [vmem:[%s3707_s5 + $0x148] sm:$0xff]  ;;  %v1973_v34 = vld [vmem:[%s3707_s5 + $0xe0] sm:$0xff] }
 0x33a   :  { %2480 = vmatprep.subr.bf16.mxu0 %v2479_v23  ;;  %v1985_v23 = vld [vmem:[%s3707_s5 + $0x140] sm:$0xff]  ;;  %v1974_v35 = vld [vmem:[%s3707_s5 + $0xe8] sm:$0xff]  ;;  %v2493_v36 = vpack.c.bf16 %v1956_v30, %v1955_v26 }
 0x33b   :  { %v2521_v37 = vpack.c.bf16 %v1986_v33, %v1985_v23  ;;  %v2495_v38 = vpack.c.bf16 %v1974_v35, %v1973_v34 }
 0x33c   :  { %2510 = vmatpush3.bf16.msra.mxu1 %v2509_v46 }
 0x33d   :  { %2482 = vmatpush3.bf16.msra.mxu0 %v2481_v41  ;;  %2512 = vmatprep.subr.bf16.mxu1 %v2511_v13 }
 0x33e   :  { %2484 = vmatprep.subr.bf16.mxu0 %v2483_v18 }
 0x340   :  { %2514 = vmatpush3.bf16.msra.mxu1 %v2513_v8 }
 0x341   :  { %2486 = vmatpush3.bf16.msra.mxu0 %v2485_v9  ;;  %2516 = vmatprep.subr.bf16.mxu1 %v2515_v17 }
 0x342   :  { %2488 = vmatprep.subr.bf16.mxu0 %v2487_v19 }
 0x344   :  { %2518 = vmatpush3.bf16.msra.mxu1 %v2517_v31 }
 0x345   :  { %2490 = vmatpush3.bf16.msra.mxu0 %v2489_v45  ;;  %2520 = vmatprep.subr.bf16.mxu1 %v2519_v27 }
 0x346   :  { %2492 = vmatprep.subr.bf16.mxu0 %v2491_v25 }
 0x348   :  { %2522 = vmatpush3.bf16.msra.mxu1 %v2521_v37 }
 0x349   :  { %2494 = vmatpush3.bf16.msra.mxu0 %v2493_v36 }
 0x34a   :  { %2496 = vmatprep.subr.bf16.mxu0 %v2495_v38 }
 0x34c   :  { %v2441_v28 = vpop.f32.mrb[8].mxu1 }
 0x34d   :  { %v1596_v21 = vadd.f32 %v2441_v28, %v3262_v5  ;;  %v1590_v39 = vpop.f32.mrb[9].mxu1 }
 0x34e   :  { %v1591_v40 = vadd.f32 %v3262_v5, %v1590_v39 }
 0x34f   :  { %v1638_v41 = vmax.f32 %v1596_v21, 0.0 }
 0x350   :  { %v1637_v58 = vmax.f32 %v1591_v40, 0.0 }
 0x351   :  { %v1821_v42 = vrot.slane %v1638_v41, 5  ;;  %v1888_v44 = vrot.slane %v1638_v41, 1  ;;  %v1855_v18 = vrot.slane %v1638_v41, 7  ;;  %v1922_v46 = vrot.slane %v1638_v41, 3 }
 0x352   :  { %v1681_v3 = vrot.slane %v1637_v58, 5  ;;  %v1748_v47 = vrot.slane %v1637_v58, 1  ;;  %v1698_v52 = vrot.slane %v1637_v58, 6  ;;  %v1765_v56 = vrot.slane %v1637_v58, 2 }
 0x353   :  { %v1822_v13 = vsel %vm1663_vm3, %v1821_v42, %v3308_v48  ;;  %v1889_v60 = vsel %vm1663_vm3, %v1888_v44, %v3311_v50  ;;  %v1715_v61 = vrot.slane %v1637_v58, 7  ;;  %v1782_v62 = vrot.slane %v1637_v58, 3 }
 0x354   :  { %v1682_v0 = vsel %vm1663_vm3, %v1681_v3, %v3317_v15  ;;  %v1749_v9 = vsel %vm1663_vm3, %v1748_v47, %v3320_v53  ;;  %v1699_v19 = vsel %vm1663_vm3, %v1698_v52, %v3323_v54  ;;  %v1766_v7 = vsel %vm1663_vm3, %v1765_v56, %v3326_v55 }
 0x355   :  { %v1716_v48 = vsel %vm1663_vm3, %v1715_v61, %v3314_v49  ;;  %v1783_v50 = vsel %vm1663_vm3, %v1782_v62, %v3329_v63  ;;  %v1856_v51 = vsel %vm1663_vm3, %v1855_v18, %v3305_v43  ;;  %v1923_v15 = vsel %vm1663_vm3, %v1922_v46, %v3332_v59 }
 0x356   :  { %v1838_v8 = vrot.slane %v1638_v41, 6  ;;  %v1905_v53 = vrot.slane %v1638_v41, 2  ;;  %v1806_v10 = vrot.slane %v1638_v41, 4  ;;  %v1662_v32 = vrot.slane %v1637_v58, 4 }
 0x357   :  { %v1733_v54 = vsel %vm1663_vm3, %v1637_v58, %v3365_v16  ;;  %v1873_v55 = vsel %vm1663_vm3, %v1638_v41, %v3377_v24 }
 0x358   :  { %v1839_v49 = vsel %vm1663_vm3, %v1838_v8, %v3335_v6  ;;  %v1906_v63 = vsel %vm1663_vm3, %v1905_v53, %v3338_v14  ;;  %v1807_v43 = vsel %vm1663_vm3, %v1806_v10, %v3359_v11  ;;  %v1664_v59 = vsel %vm1663_vm3, %v1662_v32, %v3362_v12 }
 0x363   :  { %v2444_v17 = vpop.f32.mrb[10].mxu1 }
 0x364   :  { %v1606_v57 = vadd.f32 %v2444_v17, %v3262_v5  ;;  %v1600_v20 = vpop.f32.mrb[11].mxu1 }
 0x365   :  { %v1601_v16 = vadd.f32 %v3262_v5, %v1600_v20 }
 0x366   :  { %v1640_v24 = vmax.f32 %v1606_v57, 0.0 }
 0x367   :  { %v1639_v22 = vmax.f32 %v1601_v16, 0.0 }
 0x368   :  { %v1823_v29 = vrot.slane %v1640_v24, 4  ;;  %v1890_v6 = vsel %vm1666_vm4, %v1640_v24, %v1889_v60  ;;  %v1857_v45 = vrot.slane %v1640_v24, 6  ;;  %v1924_v14 = vrot.slane %v1640_v24, 2 }
 0x369   :  { %v1683_v25 = vrot.slane %v1639_v22, 4  ;;  %v1750_v11 = vsel %vm1666_vm4, %v1639_v22, %v1749_v9  ;;  %v1700_v26 = vrot.slane %v1639_v22, 5  ;;  %v1767_v30 = vrot.slane %v1639_v22, 1 }
 0x36a   :  { %v1824_v12 = vsel %vm1666_vm4, %v1823_v29, %v1822_v13  ;;  %v1717_v31 = vrot.slane %v1639_v22, 6  ;;  %v1784_v23 = vrot.slane %v1639_v22, 2  ;;  %v1858_v27 = vsel %vm1666_vm4, %v1857_v45, %v1856_v51 }
 0x36b   :  { %v1684_v33 = vsel %vm1666_vm4, %v1683_v25, %v1682_v0  ;;  %v1701_v34 = vsel %vm1666_vm4, %v1700_v26, %v1699_v19  ;;  %v1768_v35 = vsel %vm1666_vm4, %v1767_v30, %v1766_v7  ;;  %v1925_v36 = vsel %vm1666_vm4, %v1924_v14, %v1923_v15  ;;  %v1957_v26 = vld [vmem:[%s3707_s5 + $0x60] sm:$0xff]  ;;  %v1958_v30 = vld [vmem:[%s3707_s5 + $0x68] sm:$0xff] }
 0x36c   :  { %v1718_v37 = vsel %vm1666_vm4, %v1717_v31, %v1716_v48  ;;  %v1785_v38 = vsel %vm1666_vm4, %v1784_v23, %v1783_v50  ;;  %v1840_v28 = vrot.slane %v1640_v24, 5  ;;  %v1907_v21 = vrot.slane %v1640_v24, 1  ;;  %v2003_v23 = vld [vmem:[%s3707_s5 + $0x1d0] sm:$0xff] }
 0x36d   :  { %v1808_v39 = vrot.slane %v1640_v24, 3  ;;  %v1665_v40 = vrot.slane %v1639_v22, 3  ;;  %v1734_v41 = vrot.slane %v1639_v22, 7  ;;  %v1874_v58 = vrot.slane %v1640_v24, 7 }
 0x36e   :  { %v1841_v42 = vsel %vm1666_vm4, %v1840_v28, %v1839_v49  ;;  %v1908_v44 = vsel %vm1666_vm4, %v1907_v21, %v1906_v63  ;;  %v2497_v31 = vpack.c.bf16 %v1958_v30, %v1957_v26 }
 0x36f   :  { %v1809_v18 = vsel %vm1666_vm4, %v1808_v39, %v1807_v43  ;;  %v1667_v46 = vsel %vm1666_vm4, %v1665_v40, %v1664_v59  ;;  %v1735_v3 = vsel %vm1666_vm4, %v1734_v41, %v1733_v54  ;;  %v1875_v47 = vsel %vm1666_vm4, %v1874_v58, %v1873_v55  ;;  %v1975_v39 = vld [vmem:[%s3707_s5 + $0xf0] sm:$0xff]  ;;  %v1976_v40 = vld [vmem:[%s3707_s5 + $0xf8] sm:$0xff] }
 0x370   :  { %2498 = vmatpush3.bf16.msra.mxu0 %v2497_v31  ;;  %v2499_v58 = vpack.c.bf16 %v1976_v40, %v1975_v39  ;;  %v1991_v31 = vld [vmem:[%s3707_s5 + $0x170] sm:$0xff] }
 0x372   :  { %2500 = vmatprep.subr.bf16.mxu0 %v2499_v58 }
 0x388   :  { %v2447_v52 = vpop.f32.mrb[12].mxu1 }
 0x389   :  { %v1616_v56 = vadd.f32 %v2447_v52, %v3262_v5  ;;  %v1610_v13 = vpop.f32.mrb[13].mxu1 }
 0x38a   :  { %v1611_v60 = vadd.f32 %v3262_v5, %v1610_v13 }
 0x38b   :  { %v1642_v61 = vmax.f32 %v1616_v56, 0.0 }
 0x38c   :  { %v1641_v62 = vmax.f32 %v1611_v60, 0.0 }
 0x38d   :  { %v1825_v0 = vrot.slane %v1642_v61, 3  ;;  %v1891_v9 = vrot.slane %v1642_v61, 7  ;;  %v1859_v19 = vrot.slane %v1642_v61, 5  ;;  %v1926_v7 = vrot.slane %v1642_v61, 1 }
 0x38e   :  { %v1685_v48 = vrot.slane %v1641_v62, 3  ;;  %v1751_v50 = vrot.slane %v1641_v62, 7  ;;  %v1702_v51 = vrot.slane %v1641_v62, 4  ;;  %v3545_v15 = vsel %vm1669_vm5, %v1641_v62, %v1768_v35 }
 0x38f   :  { %v1826_v8 = vsel %vm1669_vm5, %v1825_v0, %v1824_v12  ;;  %v1892_v53 = vsel %vm1669_vm5, %v1891_v9, %v1890_v6  ;;  %v1719_v10 = vrot.slane %v1641_v62, 5  ;;  %v1786_v32 = vrot.slane %v1641_v62, 1 }
 0x390   :  { %v1686_v54 = vsel %vm1669_vm5, %v1685_v48, %v1684_v33  ;;  %v1752_v55 = vsel %vm1669_vm5, %v1751_v50, %v1750_v11  ;;  %v1703_v49 = vsel %vm1669_vm5, %v1702_v51, %v1701_v34  ;;  %v1860_v63 = vsel %vm1669_vm5, %v1859_v19, %v1858_v27  ;;  %v2004_v27 = vld [vmem:[%s3707_s5 + $0x1d8] sm:$0xff]  ;;  %v1987_v33 = vld [vmem:[%s3707_s5 + $0x150] sm:$0xff]  ;;  %v2006_v48 = vld [vmem:[%s3707_s5 + $0x1e8] sm:$0xff] }
 0x391   :  { %v1720_v43 = vsel %vm1669_vm5, %v1719_v10, %v1718_v37  ;;  %v1787_v59 = vsel %vm1669_vm5, %v1786_v32, %v1785_v38  ;;  %v1927_v17 = vsel %vm1669_vm5, %v1926_v7, %v1925_v36  ;;  %v1842_v57 = vrot.slane %v1642_v61, 4  ;;  %v1988_v37 = vld [vmem:[%s3707_s5 + $0x158] sm:$0xff]  ;;  %v2005_v7 = vld [vmem:[%s3707_s5 + $0x1e0] sm:$0xff]  ;;  %v1959_v50 = vld [vmem:[%s3707_s5 + $0x70] sm:$0xff] }
 0x392   :  { %v3557_v20 = vsel %vm1669_vm5, %v1642_v61, %v1908_v44  ;;  %v1810_v16 = vrot.slane %v1642_v61, 2  ;;  %v1668_v24 = vrot.slane %v1641_v62, 2  ;;  %v1736_v22 = vrot.slane %v1641_v62, 6  ;;  %v1960_v32 = vld [vmem:[%s3707_s5 + $0x78] sm:$0xff] }
 0x393   :  { %v3560_v29 = vsel %vm1669_vm5, %v1842_v57, %v1841_v42  ;;  %v1876_v6 = vrot.slane %v1642_v61, 6  ;;  %v2523_v36 = vpack.c.bf16 %v2004_v27, %v2003_v23  ;;  %v2525_v28 = vpack.c.bf16 %v1988_v37, %v1987_v33  ;;  %v1992_v23 = vld [vmem:[%s3707_s5 + $0x178] sm:$0xff] }
 0x394   :  { %v3563_v45 = vsel %vm1669_vm5, %v1810_v16, %v1809_v18  ;;  %v3566_v14 = vsel %vm1669_vm5, %v1668_v24, %v1667_v46  ;;  %v3569_v25 = vsel %vm1669_vm5, %v1736_v22, %v1735_v3  ;;  %v2527_v16 = vpack.c.bf16 %v2006_v48, %v2005_v7  ;;  %v2007_v24 = vld [vmem:[%s3707_s5 + $0x1f0] sm:$0xff]  ;;  %v2008_v22 = vld [vmem:[%s3707_s5 + $0x1f8] sm:$0xff] }
 0x395   :  { %v3572_v11 = vsel %vm1669_vm5, %v1876_v6, %v1875_v47  ;;  %2524 = vmatprep.subr.bf16.mxu1 %v2523_v36  ;;  %v2501_v26 = vpack.c.bf16 %v1960_v32, %v1959_v50  ;;  %v2531_v36 = vpack.c.bf16 %v2008_v22, %v2007_v24 }
 0x396   :  { %2526 = vmatpush3.bf16.msra.mxu1 %v2525_v28 }
 0x397   :  { %2528 = vmatprep.subr.bf16.mxu1 %v2527_v16  ;;  %2502 = vmatpush3.bf16.msra.mxu0 %v2501_v26 }
 0x3a0   :  { %v2450_v12 = vpop.f32.mrb[14].mxu1 }
 0x3a1   :  { %v1626_v34 = vadd.f32 %v2450_v12, %v3262_v5  ;;  %v1620_v35 = vpop.f32.mrb[15].mxu1 }
 0x3a2   :  { %v1621_v38 = vadd.f32 %v3262_v5, %v1620_v35 }
 0x3a3   :  { %v3594_v21 = vmax.f32 %v1626_v34, 0.0 }
 0x3a4   :  { %v1643_v41 = vmax.f32 %v1621_v38, 0.0 }
 0x3a5   :  { %v1827_v42 = vrot.slane %v3594_v21, 2  ;;  %v1893_v5 = vrot.slane %v3594_v21, 6  ;;  %v1861_v44 = vrot.slane %v3594_v21, 4  ;;  %v1928_v18 = vsel %vm1672_vm6, %v3594_v21, %v1927_v17 }
 0x3a6   :  { %v1687_v46 = vrot.slane %v1643_v41, 2  ;;  %v1753_v3 = vrot.slane %v1643_v41, 6  ;;  %v1704_v47 = vrot.slane %v1643_v41, 3  ;;  %v1770_v52 = vrot.slane %v1643_v41, 7 }
 0x3a7   :  { %v1828_v56 = vsel %vm1672_vm6, %v1827_v42, %v1826_v8  ;;  %v1894_v13 = vsel %vm1672_vm6, %v1893_v5, %v1892_v53  ;;  %v1721_v60 = vrot.slane %v1643_v41, 4  ;;  %v1788_v61 = vsel %vm1672_vm6, %v1643_v41, %v1787_v59 }
 0x3a8   :  { %v2542_v62 = vpack.i.bf16 %v1828_v56, %v1894_v13  ;;  %v1688_v0 = vsel %vm1672_vm6, %v1687_v46, %v1686_v54  ;;  %v1754_v9 = vsel %vm1672_vm6, %v1753_v3, %v1752_v55  ;;  %v1705_v19 = vsel %vm1672_vm6, %v1704_v47, %v1703_v49  ;;  %v1989_v54 = vld [vmem:[%s3707_s5 + $0x160] sm:$0xff]  ;;  %v1990_v55 = vld [vmem:[%s3707_s5 + $0x168] sm:$0xff]  ;;  %s2602_s5 = smov 96  }
 0x3a9   :  { %v2547_v51 = vpack.i.bf16 %v1688_v0, %v1754_v9  ;;  %v1771_v8 = vsel %vm1672_vm6, %v1770_v52, %v3545_v15  ;;  %v1722_v53 = vsel %vm1672_vm6, %v1721_v60, %v1720_v43  ;;  %v1862_v10 = vsel %vm1672_vm6, %v1861_v44, %v1860_v63 }
 0x3aa   :  { %2543 = vrot.lane.b32.xlu1 %v2542_v62, %s2599_s22  ;;  %v2552_v49 = vpack.i.bf16 %v1705_v19, %v1771_v8  ;;  %v2557_v15 = vpack.i.bf16 %v1722_v53, %v1788_v61  ;;  %v2567_v59 = vpack.i.bf16 %v1862_v10, %v1928_v18  ;;  %v1844_v43 = vrot.slane %v3594_v21, 3  ;;  %v2168_v8 = vld [vmem:[#allocation2] sm:$0x1] }
 0x3ab   :  { %2548 = vrot.lane.b32.xlu0 %v2547_v51, %s2599_s22  ;;  %v1910_v63 = vrot.slane %v3594_v21, 7  ;;  %v1812_v17 = vrot.slane %v3594_v21, 1  ;;  %v1671_v57 = vrot.slane %v1643_v41, 1  ;;  %v2529_v30 = vpack.c.bf16 %v1990_v55, %v1989_v54  ;;  %v2246_v55 = vld [vmem:[%s3708_s6] ss:$0 sm:$0xff]  ;;  %s2604_s6 = smov [#allocation3]  }
 0x3ac   :  { %v1845_v6 = vsel %vm1672_vm6, %v1844_v43, %v3560_v29  ;;  %v1738_v12 = vrot.slane %v1643_v41, 5  ;;  %v1878_v37 = vrot.slane %v3594_v21, 5  ;;  %v2603_v53 = vmov 0   ;;  %s2195_s17 = sshll.u32 %s2604_s6, 4  ;;  %s2196_s17 = int_to_ptr.vmem [resolvable:$true] %s2195_s17 }
 0x3ad   :  { %v1911_v27 = vsel %vm1672_vm6, %v1910_v63, %v3557_v20  ;;  %v1813_v33 = vsel %vm1672_vm6, %v1812_v17, %v3563_v45  ;;  %v1673_v29 = vsel %vm1672_vm6, %v1671_v57, %v3566_v14  ;;  %2530 = vmatpush3.bf16.msra.mxu1 %v2529_v30  ;;  %v2533_v20 = vpack.c.bf16 %v1992_v23, %v1991_v31  ;;  %v2247_v17 = vld [vmem:[%s3709_s7] ss:$0 sm:$0xff]  ;;  %s2574_s7 = scalar_lea.vmem %s2196_s17, 16  ;;  %s2578_s18 = scalar_lea.vmem %s2196_s17, 32 }
 0x3ae   :  { %2553 = vrot.lane.b32.xlu1 %v2552_v49, %s2601_s0  ;;  %v2562_v34 = vpack.i.bf16 %v1845_v6, %v1911_v27  ;;  %v1739_v35 = vsel %vm1672_vm6, %v1738_v12, %v3569_v25  ;;  %2532 = vmatprep.subr.bf16.mxu1 %v2531_v36  ;;  %v1879_v45 = vsel %vm1672_vm6, %v1878_v37, %v3572_v11  ;;  %v2181_v6 = vand.u32 127, %v36_v1  ;;  %p2575_p0 = scmp.ne.s32.totalorder %s2196_s17, %s2574_s7  ;;  %p2579_p1 = scmp.lt.s32.totalorder %s2196_s17, %s2196_s17 }
 0x3af   :  { %2558 = vrot.lane.b32.xlu0 %v2557_v15, %s2602_s5  ;;  %2572 = vset.pattern.permute.xlu1 %v2603_v53  ;;  %p2580_p2 = scmp.lt.s32.totalorder %s2578_s18, %s2574_s7 }
 0x3b0   :  { %2573 = vset.pattern.permute.xlu0 %v2603_v53  ;;  %v2184_v30 = vsub.s32 %v2181_v6, %v2659_v2 }
 0x3b1   :  { %2534 = vmatpush3.bf16.msra.mxu1 %v2533_v20  ;;  %p2581_p3 = por %p2580_p2, %p2579_p1 }
 0x3b2   :  { %2568 = vrot.lane.b32.xlu1 %v2567_v59, %s2602_s5 }
 0x3b3   :  { %2563 = vrot.lane.b32.xlu0 %v2562_v34, %s2601_s0  ;;  %p2582_p4 = pnand %p2581_p3, %p2575_p0 }
 0x3b6   :  { %2171 = vperm.xlu1 %2572, %v2168_v8  }
 0x41c   :  { %v2544_v14 = vpop.permute.xlu1 %2543 }
 0x41d   :  { %v2549_v38 = vpop.permute.xlu0 %2548  ;;  %v2546_v11 = vunpack.i.h.bf16 %v2544_v14  ;;  %v2545_v18 = vunpack.i.l.bf16 %v2544_v14 }
 0x41e   :  { %v2551_v28 = vunpack.i.h.bf16 %v2549_v38  ;;  %v2550_v39 = vunpack.i.l.bf16 %v2549_v38 }
 0x41f   :  { %v1939_v62 = vsel %vm1367_vm12, %v1813_v33, %v2546_v11  ;;  %v1942_v19 = vsel %vm1367_vm12, %v1879_v45, %v2545_v18 }
 0x420   :  { %v2554_v25 = vpop.permute.xlu1 %2553  ;;  %v1932_v58 = vsel %vm1367_vm12, %v1673_v29, %v2551_v28  ;;  %v1936_v44 = vsel %vm1367_vm12, %v1739_v35, %v2550_v39 }
 0x421   :  { %v2556_v40 = vunpack.i.h.bf16 %v2554_v25  ;;  %v2555_v41 = vunpack.i.l.bf16 %v2554_v25  ;;  %v2559_v21 = vpop.permute.xlu0 %2558 }
 0x422   :  { %v2561_v42 = vunpack.i.h.bf16 %v2559_v21  ;;  %v2560_v5 = vunpack.i.l.bf16 %v2559_v21 }
 0x423   :  { %v1933_v46 = vsel %vm1401_vm14, %v1932_v58, %v2556_v40  ;;  %v1937_v3 = vsel %vm1401_vm14, %v1936_v44, %v2555_v41 }
 0x424   :  { %v2569_v47 = vpop.permute.xlu1 %2568  ;;  %v1938_v52 = vsel %vm1934_vm7, %v1937_v3, %v2560_v5  ;;  %v1935_v56 = vsel %vm1934_vm7, %v1933_v46, %v2561_v42 }
 0x425   :  { %v2564_v13 = vpop.permute.xlu0 %2563  ;;  %2080 = vmatprep.mubr.f32.mxu0 %v1938_v52  ;;  %v2571_v0 = vunpack.i.h.bf16 %v2569_v47  ;;  %v2570_v9 = vunpack.i.l.bf16 %v2569_v47 }
 0x426   :  { %v2566_v60 = vunpack.i.h.bf16 %v2564_v13  ;;  %v2565_v61 = vunpack.i.l.bf16 %v2564_v13  ;;  %2081 = vmatmul.mubr.f32.vlgmr.msra.gmra.mrb[24].mxu0 %v1935_v56 }
 0x428   :  { %v1940_v7 = vsel %vm1401_vm14, %v1939_v62, %v2566_v60  ;;  %v1943_v48 = vsel %vm1401_vm14, %v1942_v19, %v2565_v61 }
 0x429   :  { %v1944_v50 = vsel %vm1934_vm7, %v1943_v48, %v2570_v9  ;;  %v1941_v51 = vsel %vm1934_vm7, %v1940_v7, %v2571_v0 }
 0x42a   :  { %2150 = vmatprep.mubr.f32.mxu1 %v1944_v50 }
 0x42b   :  { %2151 = vmatmul.mubr.f32.vlgmr.msra.gmra.mrb[16].mxu1 %v1941_v51 }
 0x435   :  { %v2172_v22 = vpop.permute.xlu1 %2171 }
 0x436   :  { %v2177_v26 = vrot.slane %v2172_v22, %v38_v4 }
 0x4f9   :  { %v2331_v10 = vpop.f32.mrb[24].mxu0 }
 0x4fa   :  { %v2332_v32 = vpop.f32.mrb[25].mxu0 }
 0x4fb   :  { %v2333_v54 = vadd.f32 %v2332_v32, %v2331_v10 }
 0x4fd   :  { %v2083_v59 = vadd.f32 %v2333_v54, %v2246_v55 }
 0x4fe   :  { %v2366_v49 = vpop.f32.mrb[16].mxu1 }
 0x4ff   :  { %v2367_v15 = vpop.f32.mrb[17].mxu1 }
 0x500   :  { %v2368_v43 = vadd.f32 %v2367_v15, %v2366_v49 }
 0x502   :  { %v2153_v63 = vadd.f32 %v2368_v43, %v2083_v59 }
 0x504   :  { %v2156_v57 = vmax.f32 %v2153_v63, 0.0 }
 0x506   :  { %v2164_v16 = vmul.f32 %v2247_v17, %v2156_v57 }
 0x508   :  { %v2165_v24 = vsel %vm1401_vm14, %v2164_v16, 0.0 }
 0x509   :  { %2166 = vadd.xlane.f32.xlu0 %v2165_v24 }
 0x596   :  { %v2167_v12 = vpop.xlane.xlu0 %2166 }
 0x597   :  { %v2178_v31 = vadd.f32 %v2177_v26, %v2167_v12 }
 0x599   :  { %v2185_v23 = vrot.slane %v2178_v31, %v2184_v30 }
 0x59b   :  { %2188 = vst.msk [vmem:[#allocation3] sm:$0x1] %vm2187_vm8, %v2185_v23 }
 0x59c   :  { %2585 = shalt.err (!%p2582_p4)
}
 0x59d   :  { %s2586_s21 = scalar_lea.hbm %s3711_s9, 16 }
 0x59e   :  { %p2587_p5 = scmp.ne.s32.totalorder %s3711_s9, %s2586_s21  ;;  %p2590_p6 = scmp.lt.u32.totalorder %s2586_s21, %s3711_s9 }
 0x5a0   :  { %p2592_p7 = pnand %p2590_p6, %p2587_p5 }
 0x5a2   :  { %2595 = shalt.err (!%p2592_p7)
}
 0x5a3   :  { %2198 = dma.vmem_to_hbm [thread:$0]  %s2196_s17, 16, %s3711_s9, [#allocation4]  }
 0x5a4   :  { %2596 = dma.done.wait [#allocation4], 16  }
 0x5a5   :  { %2597 = vsyncadd [#allocation4], 4294967280 }
 0x5a6   :  { %2202 = vsyncpa [#allocation4], 1 }

</bundles_post_ra>
